<compile_context>
chip_gen: v6e
topology: v6e:2x2x1
jax: 0.10.0
libtpu: 0.0.40
codegen_flags: <defaults>
</compile_context>

<pallas_src>
import functools

import jax
import jax.numpy as jnp
import numpy as np
from jax.experimental import pallas as pl
from jax.experimental.pallas import tpu as pltpu


def _largest_divisor_leq(n, cap):
    cap = max(1, min(n, cap))
    for d in range(cap, 0, -1):
        if n % d == 0:
            return d
    return 1


def _pick_cin_chunk(cin, target):
    """Largest lane-aligned (multiple of 128) divisor of cin that is <= target, else cin."""
    if cin <= target:
        return cin
    c = (target // 128) * 128
    while c >= 128:
        if cin % c == 0:
            return c
        c -= 128
    return cin


def _conv_stats_kernel(x_ref, w_ref, y_ref, stats_ref, acc_ref, *,
                       K, rate, th, W, inv_rows, n_cin_chunks):
    """Dilated conv as K*K shift-accumulate MXU matmuls into a VMEM f32 accumulator,
    plus per-tile per-channel (sum, centered M2) BatchNorm partials."""
    t = pl.program_id(1)              # h-tile index within this image
    ck = pl.program_id(2)             # Cin-chunk index (reduction axis)
    h_base = t * th
    if th % 8 == 0:
        h_base = pl.multiple_of(h_base, 8)

    cin = x_ref.shape[-1]             # Cin chunk size
    rows = acc_ref.shape[0]           # th * W

    single_chunk = n_cin_chunks == 1
    if not single_chunk:
        @pl.when(ck == 0)
        def _init():
            acc_ref[...] = jnp.zeros_like(acc_ref)

    first = single_chunk
    for kh in range(K):               # static tap loop (1 or 9), unrolled
        for kw in range(K):
            win = x_ref[pl.ds(h_base + kh * rate, th), pl.ds(kw * rate, W), :]
            contrib = jnp.dot(win.reshape(rows, cin), w_ref[kh * K + kw],
                              preferred_element_type=jnp.float32)
            if first:
                acc_ref[...] = contrib        # overwrite: no zero-init read on the common path
                first = False
            else:
                acc_ref[...] += contrib       # VMEM accumulation (MRB in-place on v7x)

    def _finalize():
        a = acc_ref[...]
        y_ref[...] = a.astype(y_ref.dtype)
        tsum = jnp.sum(a, axis=0)                              # (Coutp,)
        d = a - tsum * inv_rows                                # centered within the tile
        stats_ref[0:1, :] = tsum[None, :]
        stats_ref[1:2, :] = jnp.sum(d * d, axis=0)[None, :]

    if single_chunk:
        _finalize()
    else:
        pl.when(ck == n_cin_chunks - 1)(_finalize)


@functools.partial(jax.jit, static_argnames=("rate", "eps", "row_tile", "cin_chunk",
                                             "mxu_dtype", "out_dtype"))
def aspp_module_forward(x_nchw, weight_oihw, gamma, beta, *, rate, eps=1e-5,
                        row_tile=1024, cin_chunk=512, mxu_dtype=jnp.bfloat16,
                        out_dtype=None):
    """Matches ASPP_module.forward: Conv2d(dilation=rate, bias=False) -> BN(batch stats) -> ReLU."""
    N, Cin, H, W = x_nchw.shape
    Cout, _, K, _ = weight_oihw.shape
    pad = 0 if K == 1 else rate                       # mirrors the module's __init__
    Coutp = ((Cout + 127) // 128) * 128               # lane-dense output channels
    out_dtype = x_nchw.dtype if out_dtype is None else out_dtype
    in_bytes = jnp.dtype(mxu_dtype).itemsize
    y_dtype = mxu_dtype
    y_bytes = jnp.dtype(y_dtype).itemsize

    # ---- wrapper glue: layout only (no data replication) ----
    x_nhwc = jnp.transpose(x_nchw, (0, 2, 3, 1))
    xp = jnp.pad(x_nhwc, ((0, 0), (pad, pad), (pad, pad), (0, 0))).astype(mxu_dtype)
    Hp, Wp = H + 2 * pad, W + 2 * pad

    # (Cout, Cin, K, K) -> (K*K, Cin, Coutp) slabs, lane-dense (zero-padded) along Cout
    w = jnp.transpose(weight_oihw, (2, 3, 1, 0)).reshape(K * K, Cin, Cout)
    w = jnp.pad(w, ((0, 0), (0, 0), (0, Coutp - Cout))).astype(mxu_dtype)

    # ---- tiling: th output rows of H per grid step (th always divides H) ----
    th = _largest_divisor_leq(H, max(1, row_tile // max(W, 1)))
    if N == 1 and th == H and H > 1:                  # keep >=2 iterations for megacore (v7x)
        th = _largest_divisor_leq(H, max(1, H // 2))
    T = H // th
    rows = th * W
    R = N * H * W

    cchunk = _pick_cin_chunk(Cin, cin_chunk)          # inner reduction axis for huge Cin (v7x)
    CK = Cin // cchunk

    # per-step VMEM footprint (double-buffered I/O + scratch + elementwise temps) with headroom;
    # never request the whole machine (v7x has only 64 MiB physical VMEM).
    footprint = (2 * Hp * Wp * cchunk * in_bytes
                 + 2 * K * K * cchunk * Coutp * in_bytes
                 + 2 * rows * Coutp * y_bytes
                 + 2 * 8 * Coutp * 4
                 + 3 * rows * Coutp * 4)
    vmem_limit = min(max(48 << 20, int(1.5 * footprint) + (8 << 20)), 100 << 20)

    # ---- pass 1: conv (shift-accumulate matmuls into VMEM acc) + partial BN stats ----
    y, stats = pl.pallas_call(
        functools.partial(_conv_stats_kernel, K=K, rate=rate, th=th, W=W,
                          inv_rows=1.0 / rows, n_cin_chunks=CK),
        grid=(N, T, CK),
        in_specs=[
            # padded image (one Cin chunk) of sample n stays VMEM-resident across its h tiles
            pl.BlockSpec((None, Hp, Wp, cchunk), lambda n, t, ck: (n, 0, 0, ck)),
            # weight slabs for this Cin chunk, resident across the whole grid when CK == 1
            pl.BlockSpec((K * K, cchunk, Coutp), lambda n, t, ck: (0, ck, 0)),
        ],
        out_specs=[
            pl.BlockSpec((None, None, rows, Coutp), lambda n, t, ck: (n, t, 0, 0)),
            pl.BlockSpec((None, None, 2, Coutp), lambda n, t, ck: (n, t, 0, 0)),
        ],
        out_shape=[
            jax.ShapeDtypeStruct((N, T, rows, Coutp), y_dtype),
            jax.ShapeDtypeStruct((N, T, 2, Coutp), jnp.float32),
        ],
        scratch_shapes=[pltpu.VMEM((rows, Coutp), jnp.float32)],
        compiler_params=pltpu.CompilerParams(
            dimension_semantics=("parallel", "parallel", "arbitrary"),
            vmem_limit_bytes=vmem_limit),
        cost_estimate=pl.CostEstimate(
            flops=2 * R * K * K * Cin * Coutp + 4 * R * Coutp,
            transcendentals=0,
            bytes_accessed=(N * Hp * Wp * Cin * in_bytes * (T if CK > 1 else 1)
                            + K * K * Cin * Coutp * in_bytes
                            + R * Coutp * y_bytes + N * T * 2 * Coutp * 4)),
    )(xp, w)

    # ---- tiny global BN reduction: Chan combine of per-tile (sum, centered M2), in f32 ----
    tsum = stats[:, :, 0, :]                              # (N, T, Coutp)
    tm2 = stats[:, :, 1, :]
    mean = jnp.sum(tsum, axis=(0, 1)) / R                 # (Coutp,)
    tile_mean = tsum / rows
    m2 = jnp.sum(tm2, axis=(0, 1)) + rows * jnp.sum((tile_mean - mean) ** 2, axis=(0, 1))
    var = jnp.maximum(m2 / R, 0.0)                        # biased variance (training-mode BN)
    inv = jax.lax.rsqrt(var + eps)
    scale = jnp.pad(gamma.astype(jnp.float32), (0, Coutp - Cout)) * inv
    shift = jnp.pad(beta.astype(jnp.float32), (0, Coutp - Cout)) - mean * scale

    # ---- epilogue: BN affine + ReLU + channel slice fused into the single NHWC->NCHW pass ----
    y_nhwc = y.reshape(N, H, W, Coutp).astype(jnp.float32)
    out_nhwc = jnp.maximum(y_nhwc * scale + shift, 0.0)[..., :Cout].astype(out_dtype)
    return jnp.transpose(out_nhwc, (0, 3, 1, 2))          # back to NCHW


def _reference(x, w, gamma, beta, *, rate, eps=1e-5):
    """Pure-JAX reference mirroring the PyTorch module (training-mode BN)."""
    K = w.shape[2]
    pad = 0 if K == 1 else rate
    y = jax.lax.conv_general_dilated(
        x, w,
        window_strides=(1, 1),
        padding=((pad, pad), (pad, pad)),
        rhs_dilation=(rate, rate),
        dimension_numbers=("NCHW", "OIHW", "NCHW"),
    )
    mean = jnp.mean(y, axis=(0, 2, 3), keepdims=True)
    var = jnp.mean((y - mean) ** 2, axis=(0, 2, 3), keepdims=True)
    y = (y - mean) / jnp.sqrt(var + eps)
    y = y * gamma.reshape(1, -1, 1, 1) + beta.reshape(1, -1, 1, 1)
    return jnp.maximum(y, 0.0)


if __name__ == "__main__":
    key = jax.random.PRNGKey(0)
    kx, kw1, kw2, kg, kb = jax.random.split(key, 5)

    N, inplanes, planes, H, W = 2, 4, 8, 16, 16
    x = jax.random.normal(kx, (N, inplanes, H, W), dtype=jnp.float32)

    ok = True
    for rate, kweight in ((2, kw1), (1, kw2)):
        ksize = 1 if rate == 1 else 3
        weight = jax.random.normal(kweight, (planes, inplanes, ksize, ksize),
                                   dtype=jnp.float32) * 0.1
        gamma = 1.0 + 0.1 * jax.random.normal(kg, (planes,), dtype=jnp.float32)
        beta = 0.1 * jax.random.normal(kb, (planes,), dtype=jnp.float32)

        ref = jax.block_until_ready(_reference(x, weight, gamma, beta, rate=rate))

        # strict f32 MXU path; small row tile exercises multi-h-tile grid + Chan stat combine
        out = jax.block_until_ready(
            aspp_module_forward(x, weight, gamma, beta, rate=rate,
                                row_tile=128, mxu_dtype=jnp.float32))
        if not np.allclose(np.asarray(out), np.asarray(ref), rtol=2e-4, atol=2e-4):
            ok = False
            print("mismatch (f32 path), rate =", rate)

        # default path: bf16 MXU operands + bf16 conv intermediate (f32 accumulation / BN math)
        out_bf16 = jax.block_until_ready(
            aspp_module_forward(x, weight, gamma, beta, rate=rate))
        if not np.allclose(np.asarray(out_bf16), np.asarray(ref), rtol=5e-2, atol=5e-2):
            ok = False
            print("mismatch (bf16 path), rate =", rate)

    if ok:
        print("KERNEL_OK")
</pallas_src>

<mosaic_0001>
module attributes {stable_mosaic.version = 11 : i64} {
  func.func @_conv_stats_kernel(%arg0: i32, %arg1: i32, %arg2: i32, %arg3: memref<1x20x20x4xf32, #tpu.memory_space<vmem>>, %arg4: memref<9x4x128xf32, #tpu.memory_space<vmem>>, %arg5: memref<1x1x128x128xf32, #tpu.memory_space<vmem>>, %arg6: memref<1x1x2x128xf32, #tpu.memory_space<vmem>>, %arg7: memref<128x128xf32, #tpu.memory_space<vmem>>) attributes {dimension_semantics = [#tpu.dimension_semantics<parallel>, #tpu.dimension_semantics<parallel>, #tpu.dimension_semantics<arbitrary>], iteration_bounds = array<i64: 2, 2, 1>, scalar_prefetch = 0 : i64, scratch_operands = 1 : i64, tpu.core_type = #tpu.core_type<tc>, window_params = [{transform_indices = @transform_0, window_bounds = array<i64: 1, 20, 20, 4>}, {transform_indices = @transform_1, window_bounds = array<i64: 9, 4, 128>}, {transform_indices = @transform_2, window_bounds = array<i64: 1, 1, 128, 128>}, {transform_indices = @transform_3, window_bounds = array<i64: 1, 1, 2, 128>}]} {
    %c8_i32 = arith.constant 8 : i32
    %0 = arith.muli %arg1, %c8_i32 : i32
    %1 = tpu.assume_multiple %0, 8 : i32
    %c0_i32 = arith.constant 0 : i32
    %2 = arith.addi %1, %c0_i32 : i32
    %c0 = arith.constant 0 : index
    %3 = arith.index_cast %2 : i32 to index
    %c0_0 = arith.constant 0 : index
    %c0_1 = arith.constant 0 : index
    %4 = vector.load %arg3[%c0, %3, %c0_0, %c0_1] : memref<1x20x20x4xf32, #tpu.memory_space<vmem>>, vector<1x8x16x4xf32>
    %5 = vector.shape_cast %4 : vector<1x8x16x4xf32> to vector<8x16x4xf32>
    %6 = vector.shape_cast %5 : vector<8x16x4xf32> to vector<128x4xf32>
    %c0_2 = arith.constant 0 : index
    %c0_3 = arith.constant 0 : index
    %c0_4 = arith.constant 0 : index
    %7 = vector.load %arg4[%c0_2, %c0_3, %c0_4] : memref<9x4x128xf32, #tpu.memory_space<vmem>>, vector<1x4x128xf32>
    %8 = vector.shape_cast %7 : vector<1x4x128xf32> to vector<4x128xf32>
    %cst = arith.constant dense<0.000000e+00> : vector<128x128xf32>
    %9 = tpu.matmul %6, %8, %cst {dimension_numbers = #tpu.dot_dimension_numbers<[1], [0], [0], [1], [0, 0, 1, 1], [], []>} : vector<128x4xf32>, vector<4x128xf32>, vector<128x128xf32> -> vector<128x128xf32>
    %c0_5 = arith.constant 0 : index
    %c0_6 = arith.constant 0 : index
    %10 = vector.load %arg7[%c0_5, %c0_6] : memref<128x128xf32, #tpu.memory_space<vmem>>, vector<128x128xf32>
    tpu.vector_store %arg7[%c0_5, %c0_6], %9 {strides = array<i32>} : memref<128x128xf32, #tpu.memory_space<vmem>>, vector<128x128xf32>,
    %c0_i32_7 = arith.constant 0 : i32
    %11 = arith.addi %1, %c0_i32_7 : i32
    %c0_8 = arith.constant 0 : index
    %12 = arith.index_cast %11 : i32 to index
    %c2 = arith.constant 2 : index
    %c0_9 = arith.constant 0 : index
    %13 = vector.load %arg3[%c0_8, %12, %c2, %c0_9] : memref<1x20x20x4xf32, #tpu.memory_space<vmem>>, vector<1x8x16x4xf32>
    %14 = vector.shape_cast %13 : vector<1x8x16x4xf32> to vector<8x16x4xf32>
    %15 = vector.shape_cast %14 : vector<8x16x4xf32> to vector<128x4xf32>
    %c1 = arith.constant 1 : index
    %c0_10 = arith.constant 0 : index
    %c0_11 = arith.constant 0 : index
    %16 = vector.load %arg4[%c1, %c0_10, %c0_11] : memref<9x4x128xf32, #tpu.memory_space<vmem>>, vector<1x4x128xf32>
    %17 = vector.shape_cast %16 : vector<1x4x128xf32> to vector<4x128xf32>
    %cst_12 = arith.constant dense<0.000000e+00> : vector<128x128xf32>
    %18 = tpu.matmul %15, %17, %cst_12 {dimension_numbers = #tpu.dot_dimension_numbers<[1], [0], [0], [1], [0, 0, 1, 1], [], []>} : vector<128x4xf32>, vector<4x128xf32>, vector<128x128xf32> -> vector<128x128xf32>
    %c0_13 = arith.constant 0 : index
    %c0_14 = arith.constant 0 : index
    %19 = vector.load %arg7[%c0_13, %c0_14] : memref<128x128xf32, #tpu.memory_space<vmem>>, vector<128x128xf32>
    %20 = arith.addf %19, %18 : vector<128x128xf32>
    %c0_15 = arith.constant 0 : index
    %c0_16 = arith.constant 0 : index
    %21 = vector.load %arg7[%c0_15, %c0_16] : memref<128x128xf32, #tpu.memory_space<vmem>>, vector<128x128xf32>
    tpu.vector_store %arg7[%c0_15, %c0_16], %20 {strides = array<i32>} : memref<128x128xf32, #tpu.memory_space<vmem>>, vector<128x128xf32>,
    %c0_i32_17 = arith.constant 0 : i32
    %22 = arith.addi %1, %c0_i32_17 : i32
    %c0_18 = arith.constant 0 : index
    %23 = arith.index_cast %22 : i32 to index
    %c4 = arith.constant 4 : index
    %c0_19 = arith.constant 0 : index
    %24 = vector.load %arg3[%c0_18, %23, %c4, %c0_19] : memref<1x20x20x4xf32, #tpu.memory_space<vmem>>, vector<1x8x16x4xf32>
    %25 = vector.shape_cast %24 : vector<1x8x16x4xf32> to vector<8x16x4xf32>
    %26 = vector.shape_cast %25 : vector<8x16x4xf32> to vector<128x4xf32>
    %c2_20 = arith.constant 2 : index
    %c0_21 = arith.constant 0 : index
    %c0_22 = arith.constant 0 : index
    %27 = vector.load %arg4[%c2_20, %c0_21, %c0_22] : memref<9x4x128xf32, #tpu.memory_space<vmem>>, vector<1x4x128xf32>
    %28 = vector.shape_cast %27 : vector<1x4x128xf32> to vector<4x128xf32>
    %cst_23 = arith.constant dense<0.000000e+00> : vector<128x128xf32>
    %29 = tpu.matmul %26, %28, %cst_23 {dimension_numbers = #tpu.dot_dimension_numbers<[1], [0], [0], [1], [0, 0, 1, 1], [], []>} : vector<128x4xf32>, vector<4x128xf32>, vector<128x128xf32> -> vector<128x128xf32>
    %c0_24 = arith.constant 0 : index
    %c0_25 = arith.constant 0 : index
    %30 = vector.load %arg7[%c0_24, %c0_25] : memref<128x128xf32, #tpu.memory_space<vmem>>, vector<128x128xf32>
    %31 = arith.addf %30, %29 : vector<128x128xf32>
    %c0_26 = arith.constant 0 : index
    %c0_27 = arith.constant 0 : index
    %32 = vector.load %arg7[%c0_26, %c0_27] : memref<128x128xf32, #tpu.memory_space<vmem>>, vector<128x128xf32>
    tpu.vector_store %arg7[%c0_26, %c0_27], %31 {strides = array<i32>} : memref<128x128xf32, #tpu.memory_space<vmem>>, vector<128x128xf32>,
    %c2_i32 = arith.constant 2 : i32
    %33 = arith.addi %1, %c2_i32 : i32
    %c0_28 = arith.constant 0 : index
    %34 = arith.index_cast %33 : i32 to index
    %c0_29 = arith.constant 0 : index
    %c0_30 = arith.constant 0 : index
    %35 = vector.load %arg3[%c0_28, %34, %c0_29, %c0_30] : memref<1x20x20x4xf32, #tpu.memory_space<vmem>>, vector<1x8x16x4xf32>
    %36 = vector.shape_cast %35 : vector<1x8x16x4xf32> to vector<8x16x4xf32>
    %37 = vector.shape_cast %36 : vector<8x16x4xf32> to vector<128x4xf32>
    %c3 = arith.constant 3 : index
    %c0_31 = arith.constant 0 : index
    %c0_32 = arith.constant 0 : index
    %38 = vector.load %arg4[%c3, %c0_31, %c0_32] : memref<9x4x128xf32, #tpu.memory_space<vmem>>, vector<1x4x128xf32>
    %39 = vector.shape_cast %38 : vector<1x4x128xf32> to vector<4x128xf32>
    %cst_33 = arith.constant dense<0.000000e+00> : vector<128x128xf32>
    %40 = tpu.matmul %37, %39, %cst_33 {dimension_numbers = #tpu.dot_dimension_numbers<[1], [0], [0], [1], [0, 0, 1, 1], [], []>} : vector<128x4xf32>, vector<4x128xf32>, vector<128x128xf32> -> vector<128x128xf32>
    %c0_34 = arith.constant 0 : index
    %c0_35 = arith.constant 0 : index
    %41 = vector.load %arg7[%c0_34, %c0_35] : memref<128x128xf32, #tpu.memory_space<vmem>>, vector<128x128xf32>
    %42 = arith.addf %41, %40 : vector<128x128xf32>
    %c0_36 = arith.constant 0 : index
    %c0_37 = arith.constant 0 : index
    %43 = vector.load %arg7[%c0_36, %c0_37] : memref<128x128xf32, #tpu.memory_space<vmem>>, vector<128x128xf32>
    tpu.vector_store %arg7[%c0_36, %c0_37], %42 {strides = array<i32>} : memref<128x128xf32, #tpu.memory_space<vmem>>, vector<128x128xf32>,
    %c2_i32_38 = arith.constant 2 : i32
    %44 = arith.addi %1, %c2_i32_38 : i32
    %c0_39 = arith.constant 0 : index
    %45 = arith.index_cast %44 : i32 to index
    %c2_40 = arith.constant 2 : index
    %c0_41 = arith.constant 0 : index
    %46 = vector.load %arg3[%c0_39, %45, %c2_40, %c0_41] : memref<1x20x20x4xf32, #tpu.memory_space<vmem>>, vector<1x8x16x4xf32>
    %47 = vector.shape_cast %46 : vector<1x8x16x4xf32> to vector<8x16x4xf32>
    %48 = vector.shape_cast %47 : vector<8x16x4xf32> to vector<128x4xf32>
    %c4_42 = arith.constant 4 : index
    %c0_43 = arith.constant 0 : index
    %c0_44 = arith.constant 0 : index
    %49 = vector.load %arg4[%c4_42, %c0_43, %c0_44] : memref<9x4x128xf32, #tpu.memory_space<vmem>>, vector<1x4x128xf32>
    %50 = vector.shape_cast %49 : vector<1x4x128xf32> to vector<4x128xf32>
    %cst_45 = arith.constant dense<0.000000e+00> : vector<128x128xf32>
    %51 = tpu.matmul %48, %50, %cst_45 {dimension_numbers = #tpu.dot_dimension_numbers<[1], [0], [0], [1], [0, 0, 1, 1], [], []>} : vector<128x4xf32>, vector<4x128xf32>, vector<128x128xf32> -> vector<128x128xf32>
    %c0_46 = arith.constant 0 : index
    %c0_47 = arith.constant 0 : index
    %52 = vector.load %arg7[%c0_46, %c0_47] : memref<128x128xf32, #tpu.memory_space<vmem>>, vector<128x128xf32>
    %53 = arith.addf %52, %51 : vector<128x128xf32>
    %c0_48 = arith.constant 0 : index
    %c0_49 = arith.constant 0 : index
    %54 = vector.load %arg7[%c0_48, %c0_49] : memref<128x128xf32, #tpu.memory_space<vmem>>, vector<128x128xf32>
    tpu.vector_store %arg7[%c0_48, %c0_49], %53 {strides = array<i32>} : memref<128x128xf32, #tpu.memory_space<vmem>>, vector<128x128xf32>,
    %c2_i32_50 = arith.constant 2 : i32
    %55 = arith.addi %1, %c2_i32_50 : i32
    %c0_51 = arith.constant 0 : index
    %56 = arith.index_cast %55 : i32 to index
    %c4_52 = arith.constant 4 : index
    %c0_53 = arith.constant 0 : index
    %57 = vector.load %arg3[%c0_51, %56, %c4_52, %c0_53] : memref<1x20x20x4xf32, #tpu.memory_space<vmem>>, vector<1x8x16x4xf32>
    %58 = vector.shape_cast %57 : vector<1x8x16x4xf32> to vector<8x16x4xf32>
    %59 = vector.shape_cast %58 : vector<8x16x4xf32> to vector<128x4xf32>
    %c5 = arith.constant 5 : index
    %c0_54 = arith.constant 0 : index
    %c0_55 = arith.constant 0 : index
    %60 = vector.load %arg4[%c5, %c0_54, %c0_55] : memref<9x4x128xf32, #tpu.memory_space<vmem>>, vector<1x4x128xf32>
    %61 = vector.shape_cast %60 : vector<1x4x128xf32> to vector<4x128xf32>
    %cst_56 = arith.constant dense<0.000000e+00> : vector<128x128xf32>
    %62 = tpu.matmul %59, %61, %cst_56 {dimension_numbers = #tpu.dot_dimension_numbers<[1], [0], [0], [1], [0, 0, 1, 1], [], []>} : vector<128x4xf32>, vector<4x128xf32>, vector<128x128xf32> -> vector<128x128xf32>
    %c0_57 = arith.constant 0 : index
    %c0_58 = arith.constant 0 : index
    %63 = vector.load %arg7[%c0_57, %c0_58] : memref<128x128xf32, #tpu.memory_space<vmem>>, vector<128x128xf32>
    %64 = arith.addf %63, %62 : vector<128x128xf32>
    %c0_59 = arith.constant 0 : index
    %c0_60 = arith.constant 0 : index
    %65 = vector.load %arg7[%c0_59, %c0_60] : memref<128x128xf32, #tpu.memory_space<vmem>>, vector<128x128xf32>
    tpu.vector_store %arg7[%c0_59, %c0_60], %64 {strides = array<i32>} : memref<128x128xf32, #tpu.memory_space<vmem>>, vector<128x128xf32>,
    %c4_i32 = arith.constant 4 : i32
    %66 = arith.addi %1, %c4_i32 : i32
    %c0_61 = arith.constant 0 : index
    %67 = arith.index_cast %66 : i32 to index
    %c0_62 = arith.constant 0 : index
    %c0_63 = arith.constant 0 : index
    %68 = vector.load %arg3[%c0_61, %67, %c0_62, %c0_63] : memref<1x20x20x4xf32, #tpu.memory_space<vmem>>, vector<1x8x16x4xf32>
    %69 = vector.shape_cast %68 : vector<1x8x16x4xf32> to vector<8x16x4xf32>
    %70 = vector.shape_cast %69 : vector<8x16x4xf32> to vector<128x4xf32>
    %c6 = arith.constant 6 : index
    %c0_64 = arith.constant 0 : index
    %c0_65 = arith.constant 0 : index
    %71 = vector.load %arg4[%c6, %c0_64, %c0_65] : memref<9x4x128xf32, #tpu.memory_space<vmem>>, vector<1x4x128xf32>
    %72 = vector.shape_cast %71 : vector<1x4x128xf32> to vector<4x128xf32>
    %cst_66 = arith.constant dense<0.000000e+00> : vector<128x128xf32>
    %73 = tpu.matmul %70, %72, %cst_66 {dimension_numbers = #tpu.dot_dimension_numbers<[1], [0], [0], [1], [0, 0, 1, 1], [], []>} : vector<128x4xf32>, vector<4x128xf32>, vector<128x128xf32> -> vector<128x128xf32>
    %c0_67 = arith.constant 0 : index
    %c0_68 = arith.constant 0 : index
    %74 = vector.load %arg7[%c0_67, %c0_68] : memref<128x128xf32, #tpu.memory_space<vmem>>, vector<128x128xf32>
    %75 = arith.addf %74, %73 : vector<128x128xf32>
    %c0_69 = arith.constant 0 : index
    %c0_70 = arith.constant 0 : index
    %76 = vector.load %arg7[%c0_69, %c0_70] : memref<128x128xf32, #tpu.memory_space<vmem>>, vector<128x128xf32>
    tpu.vector_store %arg7[%c0_69, %c0_70], %75 {strides = array<i32>} : memref<128x128xf32, #tpu.memory_space<vmem>>, vector<128x128xf32>,
    %c4_i32_71 = arith.constant 4 : i32
    %77 = arith.addi %1, %c4_i32_71 : i32
    %c0_72 = arith.constant 0 : index
    %78 = arith.index_cast %77 : i32 to index
    %c2_73 = arith.constant 2 : index
    %c0_74 = arith.constant 0 : index
    %79 = vector.load %arg3[%c0_72, %78, %c2_73, %c0_74] : memref<1x20x20x4xf32, #tpu.memory_space<vmem>>, vector<1x8x16x4xf32>
    %80 = vector.shape_cast %79 : vector<1x8x16x4xf32> to vector<8x16x4xf32>
    %81 = vector.shape_cast %80 : vector<8x16x4xf32> to vector<128x4xf32>
    %c7 = arith.constant 7 : index
    %c0_75 = arith.constant 0 : index
    %c0_76 = arith.constant 0 : index
    %82 = vector.load %arg4[%c7, %c0_75, %c0_76] : memref<9x4x128xf32, #tpu.memory_space<vmem>>, vector<1x4x128xf32>
    %83 = vector.shape_cast %82 : vector<1x4x128xf32> to vector<4x128xf32>
    %cst_77 = arith.constant dense<0.000000e+00> : vector<128x128xf32>
    %84 = tpu.matmul %81, %83, %cst_77 {dimension_numbers = #tpu.dot_dimension_numbers<[1], [0], [0], [1], [0, 0, 1, 1], [], []>} : vector<128x4xf32>, vector<4x128xf32>, vector<128x128xf32> -> vector<128x128xf32>
    %c0_78 = arith.constant 0 : index
    %c0_79 = arith.constant 0 : index
    %85 = vector.load %arg7[%c0_78, %c0_79] : memref<128x128xf32, #tpu.memory_space<vmem>>, vector<128x128xf32>
    %86 = arith.addf %85, %84 : vector<128x128xf32>
    %c0_80 = arith.constant 0 : index
    %c0_81 = arith.constant 0 : index
    %87 = vector.load %arg7[%c0_80, %c0_81] : memref<128x128xf32, #tpu.memory_space<vmem>>, vector<128x128xf32>
    tpu.vector_store %arg7[%c0_80, %c0_81], %86 {strides = array<i32>} : memref<128x128xf32, #tpu.memory_space<vmem>>, vector<128x128xf32>,
    %c4_i32_82 = arith.constant 4 : i32
    %88 = arith.addi %1, %c4_i32_82 : i32
    %c0_83 = arith.constant 0 : index
    %89 = arith.index_cast %88 : i32 to index
    %c4_84 = arith.constant 4 : index
    %c0_85 = arith.constant 0 : index
    %90 = vector.load %arg3[%c0_83, %89, %c4_84, %c0_85] : memref<1x20x20x4xf32, #tpu.memory_space<vmem>>, vector<1x8x16x4xf32>
    %91 = vector.shape_cast %90 : vector<1x8x16x4xf32> to vector<8x16x4xf32>
    %92 = vector.shape_cast %91 : vector<8x16x4xf32> to vector<128x4xf32>
    %c8 = arith.constant 8 : index
    %c0_86 = arith.constant 0 : index
    %c0_87 = arith.constant 0 : index
    %93 = vector.load %arg4[%c8, %c0_86, %c0_87] : memref<9x4x128xf32, #tpu.memory_space<vmem>>, vector<1x4x128xf32>
    %94 = vector.shape_cast %93 : vector<1x4x128xf32> to vector<4x128xf32>
    %cst_88 = arith.constant dense<0.000000e+00> : vector<128x128xf32>
    %95 = tpu.matmul %92, %94, %cst_88 {dimension_numbers = #tpu.dot_dimension_numbers<[1], [0], [0], [1], [0, 0, 1, 1], [], []>} : vector<128x4xf32>, vector<4x128xf32>, vector<128x128xf32> -> vector<128x128xf32>
    %c0_89 = arith.constant 0 : index
    %c0_90 = arith.constant 0 : index
    %96 = vector.load %arg7[%c0_89, %c0_90] : memref<128x128xf32, #tpu.memory_space<vmem>>, vector<128x128xf32>
    %97 = arith.addf %96, %95 : vector<128x128xf32>
    %c0_91 = arith.constant 0 : index
    %c0_92 = arith.constant 0 : index
    %98 = vector.load %arg7[%c0_91, %c0_92] : memref<128x128xf32, #tpu.memory_space<vmem>>, vector<128x128xf32>
    tpu.vector_store %arg7[%c0_91, %c0_92], %97 {strides = array<i32>} : memref<128x128xf32, #tpu.memory_space<vmem>>, vector<128x128xf32>,
    %c0_93 = arith.constant 0 : index
    %c0_94 = arith.constant 0 : index
    %99 = vector.load %arg7[%c0_93, %c0_94] : memref<128x128xf32, #tpu.memory_space<vmem>>, vector<128x128xf32>
    %c0_95 = arith.constant 0 : index
    %c0_96 = arith.constant 0 : index
    %c0_97 = arith.constant 0 : index
    %c0_98 = arith.constant 0 : index
    %100 = vector.load %arg5[%c0_95, %c0_96, %c0_97, %c0_98] : memref<1x1x128x128xf32, #tpu.memory_space<vmem>>, vector<1x1x128x128xf32>
    %101 = vector.shape_cast %100 : vector<1x1x128x128xf32> to vector<128x128xf32>
    %102 = vector.shape_cast %99 : vector<128x128xf32> to vector<1x1x128x128xf32>
    tpu.vector_store %arg5[%c0_95, %c0_96, %c0_97, %c0_98], %102 {strides = array<i32>} : memref<1x1x128x128xf32, #tpu.memory_space<vmem>>, vector<1x1x128x128xf32>,
    %cst_99 = arith.constant dense<0.000000e+00> : vector<128xf32>
    %103 = vector.multi_reduction <add>, %99, %cst_99 [0] : vector<128x128xf32> to vector<128xf32>
    %cst_100 = arith.constant 7.812500e-03 : f32
    %104 = vector.broadcast %cst_100 : f32 to vector<128xf32>
    %105 = arith.mulf %103, %104 : vector<128xf32>
    %106 = vector.shape_cast %105 : vector<128xf32> to vector<1x128xf32>
    %107 = vector.broadcast %106 : vector<1x128xf32> to vector<128x128xf32>
    %108 = arith.subf %99, %107 : vector<128x128xf32>
    %109 = vector.shape_cast %103 : vector<128xf32> to vector<1x128xf32>
    %c0_101 = arith.constant 0 : index
    %c0_102 = arith.constant 0 : index
    %c0_103 = arith.constant 0 : index
    %c0_104 = arith.constant 0 : index
    %110 = vector.load %arg6[%c0_101, %c0_102, %c0_103, %c0_104] : memref<1x1x2x128xf32, #tpu.memory_space<vmem>>, vector<1x1x1x128xf32>
    %111 = vector.shape_cast %110 : vector<1x1x1x128xf32> to vector<1x128xf32>
    %112 = vector.shape_cast %109 : vector<1x128xf32> to vector<1x1x1x128xf32>
    tpu.vector_store %arg6[%c0_101, %c0_102, %c0_103, %c0_104], %112 {strides = array<i32>} : memref<1x1x2x128xf32, #tpu.memory_space<vmem>>, vector<1x1x1x128xf32>,
    %113 = arith.mulf %108, %108 : vector<128x128xf32>
    %cst_105 = arith.constant dense<0.000000e+00> : vector<128xf32>
    %114 = vector.multi_reduction <add>, %113, %cst_105 [0] : vector<128x128xf32> to vector<128xf32>
    %115 = vector.shape_cast %114 : vector<128xf32> to vector<1x128xf32>
    %c0_106 = arith.constant 0 : index
    %c0_107 = arith.constant 0 : index
    %c1_108 = arith.constant 1 : index
    %c0_109 = arith.constant 0 : index
    %116 = vector.load %arg6[%c0_106, %c0_107, %c1_108, %c0_109] : memref<1x1x2x128xf32, #tpu.memory_space<vmem>>, vector<1x1x1x128xf32>
    %117 = vector.shape_cast %116 : vector<1x1x1x128xf32> to vector<1x128xf32>
    %118 = vector.shape_cast %115 : vector<1x128xf32> to vector<1x1x1x128xf32>
    tpu.vector_store %arg6[%c0_106, %c0_107, %c1_108, %c0_109], %118 {strides = array<i32>} : memref<1x1x2x128xf32, #tpu.memory_space<vmem>>, vector<1x1x1x128xf32>,
    return
  }
  func.func @transform_0(%arg0: i32, %arg1: i32, %arg2: i32) -> (i32, i32, i32, i32) {
    %c0_i32 = arith.constant 0 : i32
    %c0_i32_0 = arith.constant 0 : i32
    %c0_i32_1 = arith.constant 0 : i32
    return %arg0, %c0_i32, %c0_i32_0, %arg2 : i32, i32, i32, i32
  }
  func.func @transform_1(%arg0: i32, %arg1: i32, %arg2: i32) -> (i32, i32, i32) {
    %c0_i32 = arith.constant 0 : i32
    %c0_i32_0 = arith.constant 0 : i32
    %c0_i32_1 = arith.constant 0 : i32
    return %c0_i32, %arg2, %c0_i32_0 : i32, i32, i32
  }
  func.func @transform_2(%arg0: i32, %arg1: i32, %arg2: i32) -> (i32, i32, i32, i32) {
    %c0_i32 = arith.constant 0 : i32
    %c0_i32_0 = arith.constant 0 : i32
    %c0_i32_1 = arith.constant 0 : i32
    return %arg0, %arg1, %c0_i32, %c0_i32_0 : i32, i32, i32, i32
  }
  func.func @transform_3(%arg0: i32, %arg1: i32, %arg2: i32) -> (i32, i32, i32, i32) {
    %c0_i32 = arith.constant 0 : i32
    %c0_i32_0 = arith.constant 0 : i32
    %c0_i32_1 = arith.constant 0 : i32
    return %arg0, %arg1, %c0_i32, %c0_i32_0 : i32, i32, i32, i32
  }
}

</mosaic_0001>

<bundles_post_ra>
// kernel: aspp_module_forward.1
= control target key start
LH: loop header
LB: loop body
LE: loop exit
PB: predicated region body
PF: predicated region fallthrough
CT: control target
= control target key end

     0   :  { %s3629_s12 = smov 0   ;;  %s3631_s13 = smov 0   ;;  %s4417_s0 = inlined_call_operand.vmem [shape: f32[2,20,20,4], index: 0, kind: input, shape index: {}]   ;;  %s4418_s1 = inlined_call_operand.vmem [shape: f32[9,4,128], index: 1, kind: input, shape index: {}]   ;;  %s4419_s2 = inlined_call_operand.vmem [shape: f32[2,2,128,128], index: 2, kind: output, shape index: {0}]   ;;  %s4420_s3 = inlined_call_operand.vmem [shape: f32[2,2,2,128], index: 3, kind: output, shape index: {1}]  }
   0x1   :  { %s3633_s14 = smov 0   ;;  %s3635_s15 = smov 0  }
   0x2   :  { %s3637_s16 = smov 0  }
   0x3 LB: > { %s29_s17 = sadd.s32 1, %s3599_s14  ;;  %s33_s18 = sadd.s32 1, %s3603_s15  ;;  %s3607_s16 = sphi %s3637_s16, %s14_s16   ;;  %s3603_s15 = sphi %s3635_s15, %s4460_s15   ;;  %s3599_s14 = sphi %s3633_s14, %s4459_s14   ;;  %s3595_s13 = sphi %s3631_s13, %s4458_s13   ;;  %s3591_s12 = sphi %s3629_s12, %s4457_s12  }
   0x4   : > { %p31_p0 = scmp.ge.s32.totalorder %s29_s17, 2  ;;  %p2867_p1 = scmp.ge.s32.totalorder %s3607_s16, 1 }
   0x5   : > { %p177_p2 = scmp.lt.s32.totalorder %s3607_s16, 5 }
   0x6   : > { %s4462_s17 = smov (%p31_p0, %s29_s17), 0  ;;  %s4464_s18 = smov (!%p31_p0, %s33_s18), %s3603_s15 }
   0x7   : > { %p178_p3 = pnand %p2867_p1, %p177_p2  ;;  %p35_p4 = scmp.ge.s32.totalorder %s4464_s18, 2 }
   0x9   : > { %s4466_s18 = smov (%p35_p4, %s4464_s18), 0  ;;  %181 = sbr.rel (%p178_p3) target bundleno = 430 (0x1ae), region = 28 }
   0xe   : > { %v268_v0 = vld [vmem:[%s4418_s1] sm:$0xf]  ;;  %vm318_vm0 = vcmask 1043456   ;;  %p220_p5 = scmp.lt.s32.totalorder %s3595_s13, 1  ;;  %v2893_v1 = vld [vmem:[%s4418_s1 + $0x4] sm:$0xf] }
   0xf   : > { %3526 = vmatprep.subr.msk.mxu1 %vm318_vm0, %v268_v0  ;;  %3292 = vmatprep.subr.msk.mxu0 %vm318_vm0, %v268_v0  ;;  %v2911_v2 = vld [vmem:[%s4418_s1 + $0x8] sm:$0xf]  ;;  %s2875_s25 = smul.u32 192, %s3591_s12  ;;  %vm269_vm1 = vcmask 31744   ;;  %v2947_v9 = vld [vmem:[%s4418_s1 + $0xc] sm:$0xf] }
  0x10   : > { %3527 = vmatpush3.msk.msra.mxu1 %vm318_vm0, %v268_v0  ;;  %3293 = vmatpush3.msk.msra.mxu0 %vm318_vm0, %v268_v0  ;;  %s4468_s13 = smov (!%p220_p5, %s3595_s13), 1  ;;  %v2981_v10 = vld [vmem:[%s4418_s1 + $0x10] sm:$0xf]  ;;  %v3776_v27 = vld [vmem:[%s4418_s1 + $0x14] sm:$0xf]  ;;  %p234_p6 = scmp.lt.s32.totalorder %s3591_s12, 1 }
  0x11   : > { %3318 = vmatprep.subr.msk.mxu1 %vm318_vm0, %v2893_v1  ;;  %3344 = vmatprep.subr.msk.mxu0 %vm318_vm0, %v2911_v2  ;;  %s3528_s26 = smul.u32 480, %s4468_s13  ;;  %v3781_v28 = vld [vmem:[%s4418_s1 + $0x18] sm:$0xf]  ;;  %v3085_v55 = vld [vmem:[%s4418_s1 + $0x1c] sm:$0xf]  ;;  %s2870_s24 = sshll.u32 %s4468_s13, 5 }
  0x12   : > { %v3119_v56 = vld [vmem:[%s4418_s1 + $0x20] sm:$0xf]  ;;  %s4470_s12 = smov (!%p234_p6, %s3591_s12), 1 }
  0x13   : > { %s227_s29 = scalar_lea.vmem %s4417_s0, %s3528_s26  ;;  %s2869_s23 = sshll.u32 %s4470_s12, 4 }
  0x14   : > { %s3683_s30 = scalar_lea.vmem %s227_s29, %s2875_s25  ;;  %s238_s25 = sadd.s32 %s2870_s24, %s2869_s23 }
  0x15   : > { %v252_v3 = vld [vmem:[%s3683_s30] sm:$0xff]  ;;  %v253_v5 = vld [vmem:[%s3683_s30 + $0x8] sm:$0xff]  ;;  %v254_v7 = vld [vmem:[%s3683_s30 + $0x18] sm:$0xff]  ;;  %s2871_s26 = sshll.u32 %s238_s25, 3 }
  0x16   : > { %v3687_v4 = vld [vmem:[%s3683_s30 + $0x60] sm:$0xff]  ;;  %3294 = vmatprep.mubr.msk.f32.mxu0 %vm269_vm1, %v252_v3  ;;  %v3694_v6 = vld [vmem:[%s3683_s30 + $0x68] sm:$0xff]  ;;  %v3698_v8 = vld [vmem:[%s3683_s30 + $0x78] sm:$0xff]  ;;  %s4274_s29 = scalar_lea.vmem %s4419_s2, %s2871_s26 }
  0x17   : > { %3306 = vmatprep.mubr.msk.f32.mxu1 %vm269_vm1, %v3687_v4  ;;  %3295 = vmatmul.mubr.msk.f32.vlgmr.msra.gmra.mxu0 %vm269_vm1, %v253_v5  ;;  %v255_v11 = vld [vmem:[%s3683_s30 + $0x20] sm:$0xff]  ;;  %v3719_v13 = vld [vmem:[%s3683_s30 + $0x30] sm:$0xff]  ;;  %v3734_v15 = vld [vmem:[%s3683_s30 + $0x38] sm:$0xff] }
  0x18   : > { %3307 = vmatmul.mubr.msk.f32.vlgmr.msra.gmra.mxu1 %vm269_vm1, %v3694_v6  ;;  %3345 = vmatpush3.msk.msra.mxu0 %vm318_vm0, %v2911_v2  ;;  %v3713_v12 = vld [vmem:[%s3683_s30 + $0x80] sm:$0xff]  ;;  %v3722_v14 = vld [vmem:[%s3683_s30 + $0x90] sm:$0xff]  ;;  %v3737_v16 = vld [vmem:[%s3683_s30 + $0x98] sm:$0xff] }
  0x19   : > { %3319 = vmatpush3.msk.msra.mxu1 %vm318_vm0, %v2893_v1  ;;  %3297 = vmatprep.mubr.msk.f32.mxu0 %vm269_vm1, %v254_v7  ;;  %v3740_v17 = vld [vmem:[%s3683_s30 + $0x48] sm:$0xff]  ;;  %v3754_v19 = vld [vmem:[%s3683_s30 + $0x50] sm:$0xff]  ;;  %v485_v25 = vld [vmem:[%s3683_s30 + $0x1a] sm:$0xff] }
  0x1a   : > { %3309 = vmatprep.mubr.msk.f32.mxu1 %vm269_vm1, %v3698_v8  ;;  %3370 = vmatprep.subr.msk.mxu1 %vm318_vm0, %v2947_v9  ;;  %v3743_v18 = vld [vmem:[%s3683_s30 + $0xa8] sm:$0xff]  ;;  %v3757_v20 = vld [vmem:[%s3683_s30 + $0xb0] sm:$0xff]  ;;  %v747_v26 = vld [vmem:[%s3683_s30 + $0x1c] sm:$0xff] }
  0x1b   : > { %3396 = vmatprep.subr.msk.mxu0 %vm318_vm0, %v2981_v10  ;;  %3298 = vmatmul.mubr.msk.f32.gmra.mxu0 %vm269_vm1, %v255_v11  ;;  %v483_v21 = vld [vmem:[%s3683_s30 + $0x2] sm:$0xff]  ;;  %v484_v23 = vld [vmem:[%s3683_s30 + $0xa] sm:$0xff]  ;;  %v487_v31 = vld [vmem:[%s3683_s30 + $0x32] sm:$0xff] }
  0x1c   : > { %3310 = vmatmul.mubr.msk.f32.gmra.mxu1 %vm269_vm1, %v3713_v12  ;;  %3300 = vmatprep.mubr.msk.f32.mxu0 %vm269_vm1, %v3719_v13  ;;  %v745_v22 = vld [vmem:[%s3683_s30 + $0x4] sm:$0xff]  ;;  %v746_v24 = vld [vmem:[%s3683_s30 + $0xc] sm:$0xff]  ;;  %v3791_v32 = vld [vmem:[%s3683_s30 + $0x34] sm:$0xff] }
  0x1d   : > { %3312 = vmatprep.mubr.msk.f32.mxu1 %vm269_vm1, %v3722_v14  ;;  %v486_v29 = vld [vmem:[%s3683_s30 + $0x22] sm:$0xff]  ;;  %v488_v33 = vld [vmem:[%s3683_s30 + $0x3a] sm:$0xff]  ;;  %v489_v35 = vld [vmem:[%s3683_s30 + $0x4a] sm:$0xff] }
  0x1e   : > { %v748_v30 = vld [vmem:[%s3683_s30 + $0x24] sm:$0xff]  ;;  %v3804_v34 = vld [vmem:[%s3683_s30 + $0x3c] sm:$0xff]  ;;  %v3808_v36 = vld [vmem:[%s3683_s30 + $0x4c] sm:$0xff] }
  0x1f   : > { %3301 = vmatmul.mubr.msk.f32.gmra.mxu0 %vm269_vm1, %v3734_v15  ;;  %v490_v37 = vld [vmem:[%s3683_s30 + $0x52] sm:$0xff]  ;;  %v3821_v39 = vld [vmem:[%s3683_s30 + $0x62] sm:$0xff]  ;;  %v3834_v41 = vld [vmem:[%s3683_s30 + $0x6a] sm:$0xff] }
  0x20   : > { %3313 = vmatmul.mubr.msk.f32.gmra.mxu1 %vm269_vm1, %v3737_v16  ;;  %3303 = vmatprep.mubr.msk.f32.mxu0 %vm269_vm1, %v3740_v17  ;;  %v3818_v38 = vld [vmem:[%s3683_s30 + $0x54] sm:$0xff]  ;;  %v3824_v40 = vld [vmem:[%s3683_s30 + $0x64] sm:$0xff]  ;;  %v3837_v42 = vld [vmem:[%s3683_s30 + $0x6c] sm:$0xff] }
  0x21   : > { %3315 = vmatprep.mubr.msk.f32.mxu1 %vm269_vm1, %v3743_v18  ;;  %v3840_v43 = vld [vmem:[%s3683_s30 + $0x7a] sm:$0xff]  ;;  %v3854_v45 = vld [vmem:[%s3683_s30 + $0x82] sm:$0xff]  ;;  %v3860_v47 = vld [vmem:[%s3683_s30 + $0x92] sm:$0xff] }
  0x22   : > { %v3843_v44 = vld [vmem:[%s3683_s30 + $0x7c] sm:$0xff]  ;;  %v3857_v46 = vld [vmem:[%s3683_s30 + $0x84] sm:$0xff]  ;;  %v3863_v48 = vld [vmem:[%s3683_s30 + $0x94] sm:$0xff] }
  0x23   : > { %3304 = vmatmul.mubr.msk.f32.gmra.mxu0 %vm269_vm1, %v3754_v19  ;;  %v3874_v49 = vld [vmem:[%s3683_s30 + $0x9a] sm:$0xff]  ;;  %v3880_v51 = vld [vmem:[%s3683_s30 + $0xaa] sm:$0xff]  ;;  %v3894_v53 = vld [vmem:[%s3683_s30 + $0xb2] sm:$0xff] }
  0x24   : > { %3316 = vmatmul.mubr.msk.f32.gmra.mxu1 %vm269_vm1, %v3757_v20  ;;  %3346 = vmatprep.mubr.msk.f32.mxu0 %vm269_vm1, %v745_v22  ;;  %v3877_v50 = vld [vmem:[%s3683_s30 + $0x9c] sm:$0xff]  ;;  %v3883_v52 = vld [vmem:[%s3683_s30 + $0xac] sm:$0xff]  ;;  %v3897_v54 = vld [vmem:[%s3683_s30 + $0xb4] sm:$0xff] }
  0x25   : > { %3320 = vmatprep.mubr.msk.f32.mxu1 %vm269_vm1, %v483_v21  ;;  %v2943_v57 = vld [vmem:[%s3683_s30 + $0xc0] sm:$0xff]  ;;  %v2944_v59 = vld [vmem:[%s3683_s30 + $0xc8] sm:$0xff]  ;;  %v2945_v61 = vld [vmem:[%s3683_s30 + $0xd8] sm:$0xff] }
  0x26   : > { %v3957_v58 = vld [vmem:[%s3683_s30 + $0xc2] sm:$0xff]  ;;  %v3968_v60 = vld [vmem:[%s3683_s30 + $0xca] sm:$0xff]  ;;  %v3972_v62 = vld [vmem:[%s3683_s30 + $0xda] sm:$0xff] }
  0x27   : > { %3347 = vmatmul.mubr.msk.f32.vlgmr.msra.gmra.mxu0 %vm269_vm1, %v746_v24  ;;  %v2946_v63 = vld [vmem:[%s3683_s30 + $0xe0] sm:$0xff]  ;;  %v3047_v2 = vld [vmem:[%s3683_s30 + $0xf0] sm:$0xff] }
  0x28   : > { %3321 = vmatmul.mubr.msk.f32.vlgmr.msra.gmra.mxu1 %vm269_vm1, %v484_v23  ;;  %3397 = vmatpush3.msk.msra.mxu0 %vm318_vm0, %v2981_v10  ;;  %v3982_v0 = vld [vmem:[%s3683_s30 + $0xe2] sm:$0xff]  ;;  %v3012_v3 = vld [vmem:[%s3683_s30 + $0xcc] sm:$0xff]  ;;  %v3115_v10 = vld [vmem:[%s3683_s30 + $0xf4] sm:$0xff] }
  0x29   : > { %3371 = vmatpush3.msk.msra.mxu1 %vm318_vm0, %v2947_v9  ;;  %3323 = vmatprep.mubr.msk.f32.mxu1 %vm269_vm1, %v485_v25  ;;  %v3011_v1 = vld [vmem:[%s3683_s30 + $0xc4] sm:$0xff]  ;;  %v3013_v5 = vld [vmem:[%s3683_s30 + $0xdc] sm:$0xff]  ;;  %v3081_v9 = vld [vmem:[%s3683_s30 + $0xf2] sm:$0xff] }
  0x2a   : > { %3349 = vmatprep.mubr.msk.f32.mxu0 %vm269_vm1, %v747_v26  ;;  %3422 = vmatprep.subr.msk.mxu1 %vm318_vm0, %v3776_v27  ;;  %v3014_v7 = vld [vmem:[%s3683_s30 + $0xe4] sm:$0xff]  ;;  %v3082_v11 = vld [vmem:[%s3683_s30 + $0xfa] sm:$0xff] }
  0x2b   : > { %3448 = vmatprep.subr.msk.mxu0 %vm318_vm0, %v3781_v28  ;;  %3350 = vmatmul.mubr.msk.f32.gmra.mxu0 %vm269_vm1, %v748_v30 }
  0x2c   : > { %3324 = vmatmul.mubr.msk.f32.gmra.mxu1 %vm269_vm1, %v486_v29  ;;  %3352 = vmatprep.mubr.msk.f32.mxu0 %vm269_vm1, %v3791_v32 }
  0x2d   : > { %3326 = vmatprep.mubr.msk.f32.mxu1 %vm269_vm1, %v487_v31 }
  0x2f   : > { %3353 = vmatmul.mubr.msk.f32.gmra.mxu0 %vm269_vm1, %v3804_v34 }
  0x30   : > { %3327 = vmatmul.mubr.msk.f32.gmra.mxu1 %vm269_vm1, %v488_v33  ;;  %3355 = vmatprep.mubr.msk.f32.mxu0 %vm269_vm1, %v3808_v36 }
  0x31   : > { %3329 = vmatprep.mubr.msk.f32.mxu1 %vm269_vm1, %v489_v35 }
  0x33   : > { %3356 = vmatmul.mubr.msk.f32.gmra.mxu0 %vm269_vm1, %v3818_v38 }
  0x34   : > { %3330 = vmatmul.mubr.msk.f32.gmra.mxu1 %vm269_vm1, %v490_v37  ;;  %3358 = vmatprep.mubr.msk.f32.mxu0 %vm269_vm1, %v3824_v40 }
  0x35   : > { %3332 = vmatprep.mubr.msk.f32.mxu1 %vm269_vm1, %v3821_v39 }
  0x37   : > { %3359 = vmatmul.mubr.msk.f32.gmra.mxu0 %vm269_vm1, %v3837_v42 }
  0x38   : > { %3333 = vmatmul.mubr.msk.f32.gmra.mxu1 %vm269_vm1, %v3834_v41  ;;  %3361 = vmatprep.mubr.msk.f32.mxu0 %vm269_vm1, %v3843_v44 }
  0x39   : > { %3335 = vmatprep.mubr.msk.f32.mxu1 %vm269_vm1, %v3840_v43 }
  0x3b   : > { %3362 = vmatmul.mubr.msk.f32.gmra.mxu0 %vm269_vm1, %v3857_v46 }
  0x3c   : > { %3336 = vmatmul.mubr.msk.f32.gmra.mxu1 %vm269_vm1, %v3854_v45  ;;  %3364 = vmatprep.mubr.msk.f32.mxu0 %vm269_vm1, %v3863_v48 }
  0x3d   : > { %3338 = vmatprep.mubr.msk.f32.mxu1 %vm269_vm1, %v3860_v47 }
  0x3f   : > { %3365 = vmatmul.mubr.msk.f32.gmra.mxu0 %vm269_vm1, %v3877_v50 }
  0x40   : > { %3339 = vmatmul.mubr.msk.f32.gmra.mxu1 %vm269_vm1, %v3874_v49  ;;  %3367 = vmatprep.mubr.msk.f32.mxu0 %vm269_vm1, %v3883_v52 }
  0x41   : > { %3341 = vmatprep.mubr.msk.f32.mxu1 %vm269_vm1, %v3880_v51 }
  0x43   : > { %3368 = vmatmul.mubr.msk.f32.gmra.mxu0 %vm269_vm1, %v3897_v54 }
  0x44   : > { %3342 = vmatmul.mubr.msk.f32.gmra.mxu1 %vm269_vm1, %v3894_v53  ;;  %3398 = vmatprep.mubr.msk.f32.mxu0 %vm269_vm1, %v487_v31 }
  0x45   : > { %3372 = vmatprep.mubr.msk.f32.mxu1 %vm269_vm1, %v3719_v13  ;;  %v3083_v13 = vld [vmem:[%s3683_s30 + $0x10a] sm:$0xff] }
  0x47   : > { %3399 = vmatmul.mubr.msk.f32.vlgmr.msra.gmra.mxu0 %vm269_vm1, %v488_v33 }
  0x48   : > { %3373 = vmatmul.mubr.msk.f32.vlgmr.msra.gmra.mxu1 %vm269_vm1, %v3734_v15  ;;  %3449 = vmatpush3.msk.msra.mxu0 %vm318_vm0, %v3781_v28  ;;  %v3084_v15 = vld [vmem:[%s3683_s30 + $0x112] sm:$0xff] }
  0x49   : > { %3423 = vmatpush3.msk.msra.mxu1 %vm318_vm0, %v3776_v27  ;;  %3375 = vmatprep.mubr.msk.f32.mxu1 %vm269_vm1, %v3740_v17 }
  0x4a   : > { %3401 = vmatprep.mubr.msk.f32.mxu0 %vm269_vm1, %v489_v35  ;;  %3474 = vmatprep.subr.msk.mxu1 %vm318_vm0, %v3085_v55 }
  0x4b   : > { %3500 = vmatprep.subr.msk.mxu0 %vm318_vm0, %v3119_v56  ;;  %3402 = vmatmul.mubr.msk.f32.gmra.mxu0 %vm269_vm1, %v490_v37 }
  0x4c   : > { %3376 = vmatmul.mubr.msk.f32.gmra.mxu1 %vm269_vm1, %v3754_v19  ;;  %3404 = vmatprep.mubr.msk.f32.mxu0 %vm269_vm1, %v3821_v39 }
  0x4d   : > { %3378 = vmatprep.mubr.msk.f32.mxu1 %vm269_vm1, %v3687_v4 }
  0x4f   : > { %3405 = vmatmul.mubr.msk.f32.gmra.mxu0 %vm269_vm1, %v3834_v41 }
  0x50   : > { %3379 = vmatmul.mubr.msk.f32.gmra.mxu1 %vm269_vm1, %v3694_v6  ;;  %3407 = vmatprep.mubr.msk.f32.mxu0 %vm269_vm1, %v3840_v43 }
  0x51   : > { %3381 = vmatprep.mubr.msk.f32.mxu1 %vm269_vm1, %v3698_v8 }
  0x53   : > { %3408 = vmatmul.mubr.msk.f32.gmra.mxu0 %vm269_vm1, %v3854_v45 }
  0x54   : > { %3382 = vmatmul.mubr.msk.f32.gmra.mxu1 %vm269_vm1, %v3713_v12  ;;  %3410 = vmatprep.mubr.msk.f32.mxu0 %vm269_vm1, %v3860_v47 }
  0x55   : > { %3384 = vmatprep.mubr.msk.f32.mxu1 %vm269_vm1, %v3722_v14 }
  0x57   : > { %3411 = vmatmul.mubr.msk.f32.gmra.mxu0 %vm269_vm1, %v3874_v49 }
  0x58   : > { %3385 = vmatmul.mubr.msk.f32.gmra.mxu1 %vm269_vm1, %v3737_v16  ;;  %3413 = vmatprep.mubr.msk.f32.mxu0 %vm269_vm1, %v3880_v51 }
  0x59   : > { %3387 = vmatprep.mubr.msk.f32.mxu1 %vm269_vm1, %v3743_v18 }
  0x5b   : > { %3414 = vmatmul.mubr.msk.f32.gmra.mxu0 %vm269_vm1, %v3894_v53 }
  0x5c   : > { %3388 = vmatmul.mubr.msk.f32.gmra.mxu1 %vm269_vm1, %v3757_v20  ;;  %3416 = vmatprep.mubr.msk.f32.mxu0 %vm269_vm1, %v3957_v58 }
  0x5d   : > { %3390 = vmatprep.mubr.msk.f32.mxu1 %vm269_vm1, %v2943_v57 }
  0x5f   : > { %3417 = vmatmul.mubr.msk.f32.gmra.mxu0 %vm269_vm1, %v3968_v60 }
  0x60   : > { %3391 = vmatmul.mubr.msk.f32.gmra.mxu1 %vm269_vm1, %v2944_v59  ;;  %3419 = vmatprep.mubr.msk.f32.mxu0 %vm269_vm1, %v3972_v62 }
  0x61   : > { %3393 = vmatprep.mubr.msk.f32.mxu1 %vm269_vm1, %v2945_v61 }
  0x63   : > { %3420 = vmatmul.mubr.msk.f32.gmra.mxu0 %vm269_vm1, %v3982_v0 }
  0x64   : > { %3394 = vmatmul.mubr.msk.f32.gmra.mxu1 %vm269_vm1, %v2946_v63  ;;  %3450 = vmatprep.mubr.msk.f32.mxu0 %vm269_vm1, %v3687_v4  ;;  %v3048_v4 = vld [vmem:[%s3683_s30 + $0xf8] sm:$0xff] }
  0x65   : > { %3424 = vmatprep.mubr.msk.f32.mxu1 %vm269_vm1, %v3791_v32 }
  0x67   : > { %3451 = vmatmul.mubr.msk.f32.vlgmr.msra.gmra.mxu0 %vm269_vm1, %v3694_v6  ;;  %v3049_v6 = vld [vmem:[%s3683_s30 + $0x108] sm:$0xff] }
  0x68   : > { %3425 = vmatmul.mubr.msk.f32.vlgmr.msra.gmra.mxu1 %vm269_vm1, %v3804_v34  ;;  %3501 = vmatpush3.msk.msra.mxu0 %vm318_vm0, %v3119_v56 }
  0x69   : > { %3475 = vmatpush3.msk.msra.mxu1 %vm318_vm0, %v3085_v55  ;;  %3427 = vmatprep.mubr.msk.f32.mxu1 %vm269_vm1, %v3808_v36 }
  0x6a   : > { %3453 = vmatprep.mubr.msk.f32.mxu0 %vm269_vm1, %v3698_v8  ;;  %v3050_v8 = vld [vmem:[%s3683_s30 + $0x110] sm:$0xff] }
  0x6b   : > { %3454 = vmatmul.mubr.msk.f32.gmra.mxu0 %vm269_vm1, %v3713_v12  ;;  %v3116_v12 = vld [vmem:[%s3683_s30 + $0xfc] sm:$0xff] }
  0x6c   : > { %3428 = vmatmul.mubr.msk.f32.gmra.mxu1 %vm269_vm1, %v3818_v38  ;;  %3456 = vmatprep.mubr.msk.f32.mxu0 %vm269_vm1, %v3722_v14  ;;  %v3117_v14 = vld [vmem:[%s3683_s30 + $0x10c] sm:$0xff] }
  0x6d   : > { %3430 = vmatprep.mubr.msk.f32.mxu1 %vm269_vm1, %v3824_v40 }
  0x6f   : > { %3457 = vmatmul.mubr.msk.f32.gmra.mxu0 %vm269_vm1, %v3737_v16  ;;  %v3118_v16 = vld [vmem:[%s3683_s30 + $0x114] sm:$0xff]  ;;  %s2872_s30 = sshll.u32 %s4468_s13, 1 }
  0x70   : > { %3431 = vmatmul.mubr.msk.f32.gmra.mxu1 %vm269_vm1, %v3837_v42  ;;  %3459 = vmatprep.mubr.msk.f32.mxu0 %vm269_vm1, %v3743_v18  ;;  %s246_s4 = sadd.s32 %s2872_s30, %s4470_s12 }
  0x71   : > { %3433 = vmatprep.mubr.msk.f32.mxu1 %vm269_vm1, %v3843_v44  ;;  %s2873_s5 = sshll.u32 %s246_s4, 1 }
  0x72   : > { %s4388_s8 = scalar_lea.vmem %s4420_s3, %s2873_s5 }
  0x73   : > { %3460 = vmatmul.mubr.msk.f32.gmra.mxu0 %vm269_vm1, %v3757_v20 }
  0x74   : > { %3434 = vmatmul.mubr.msk.f32.gmra.mxu1 %vm269_vm1, %v3857_v46  ;;  %3462 = vmatprep.mubr.msk.f32.mxu0 %vm269_vm1, %v2943_v57 }
  0x75   : > { %3436 = vmatprep.mubr.msk.f32.mxu1 %vm269_vm1, %v3863_v48 }
  0x77   : > { %3463 = vmatmul.mubr.msk.f32.gmra.mxu0 %vm269_vm1, %v2944_v59 }
  0x78   : > { %3437 = vmatmul.mubr.msk.f32.gmra.mxu1 %vm269_vm1, %v3877_v50  ;;  %3465 = vmatprep.mubr.msk.f32.mxu0 %vm269_vm1, %v2945_v61 }
  0x79   : > { %3439 = vmatprep.mubr.msk.f32.mxu1 %vm269_vm1, %v3883_v52 }
  0x7b   : > { %3466 = vmatmul.mubr.msk.f32.gmra.mxu0 %vm269_vm1, %v2946_v63 }
  0x7c   : > { %3440 = vmatmul.mubr.msk.f32.gmra.mxu1 %vm269_vm1, %v3897_v54  ;;  %3468 = vmatprep.mubr.msk.f32.mxu0 %vm269_vm1, %v3047_v2 }
  0x7d   : > { %3442 = vmatprep.mubr.msk.f32.mxu1 %vm269_vm1, %v3011_v1 }
  0x7f   : > { %3469 = vmatmul.mubr.msk.f32.gmra.mxu0 %vm269_vm1, %v3048_v4 }
  0x80   : > { %3443 = vmatmul.mubr.msk.f32.gmra.mxu1 %vm269_vm1, %v3012_v3  ;;  %3471 = vmatprep.mubr.msk.f32.mxu0 %vm269_vm1, %v3049_v6 }
  0x81   : > { %3445 = vmatprep.mubr.msk.f32.mxu1 %vm269_vm1, %v3013_v5 }
  0x83   : > { %3472 = vmatmul.mubr.msk.f32.gmra.mxu0 %vm269_vm1, %v3050_v8 }
  0x84   : > { %3446 = vmatmul.mubr.msk.f32.gmra.mxu1 %vm269_vm1, %v3014_v7  ;;  %3502 = vmatprep.mubr.msk.f32.mxu0 %vm269_vm1, %v3824_v40 }
  0x85   : > { %3476 = vmatprep.mubr.msk.f32.mxu1 %vm269_vm1, %v3821_v39 }
  0x87   : > { %3503 = vmatmul.mubr.msk.f32.vlgmr.msra.gmra.mxu0 %vm269_vm1, %v3837_v42 }
  0x88   : > { %3477 = vmatmul.mubr.msk.f32.vlgmr.msra.gmra.mxu1 %vm269_vm1, %v3834_v41  ;;  %3505 = vmatprep.mubr.msk.f32.mxu0 %vm269_vm1, %v3843_v44 }
  0x89   : > { %3479 = vmatprep.mubr.msk.f32.mxu1 %vm269_vm1, %v3840_v43 }
  0x8b   : > { %3506 = vmatmul.mubr.msk.f32.gmra.mxu0 %vm269_vm1, %v3857_v46 }
  0x8c   : > { %3480 = vmatmul.mubr.msk.f32.gmra.mxu1 %vm269_vm1, %v3854_v45  ;;  %3508 = vmatprep.mubr.msk.f32.mxu0 %vm269_vm1, %v3863_v48 }
  0x8d   : > { %3482 = vmatprep.mubr.msk.f32.mxu1 %vm269_vm1, %v3860_v47 }
  0x8f   : > { %3509 = vmatmul.mubr.msk.f32.gmra.mxu0 %vm269_vm1, %v3877_v50 }
  0x90   : > { %3483 = vmatmul.mubr.msk.f32.gmra.mxu1 %vm269_vm1, %v3874_v49  ;;  %3511 = vmatprep.mubr.msk.f32.mxu0 %vm269_vm1, %v3883_v52 }
  0x91   : > { %3485 = vmatprep.mubr.msk.f32.mxu1 %vm269_vm1, %v3880_v51 }
  0x93   : > { %3512 = vmatmul.mubr.msk.f32.gmra.mxu0 %vm269_vm1, %v3897_v54 }
  0x94   : > { %3486 = vmatmul.mubr.msk.f32.gmra.mxu1 %vm269_vm1, %v3894_v53  ;;  %3514 = vmatprep.mubr.msk.f32.mxu0 %vm269_vm1, %v3011_v1 }
  0x95   : > { %3488 = vmatprep.mubr.msk.f32.mxu1 %vm269_vm1, %v3957_v58 }
  0x97   : > { %3515 = vmatmul.mubr.msk.f32.gmra.mxu0 %vm269_vm1, %v3012_v3 }
  0x98   : > { %3489 = vmatmul.mubr.msk.f32.gmra.mxu1 %vm269_vm1, %v3968_v60  ;;  %3517 = vmatprep.mubr.msk.f32.mxu0 %vm269_vm1, %v3013_v5 }
  0x99   : > { %3491 = vmatprep.mubr.msk.f32.mxu1 %vm269_vm1, %v3972_v62 }
  0x9b   : > { %3518 = vmatmul.mubr.msk.f32.gmra.mxu0 %vm269_vm1, %v3014_v7 }
  0x9c   : > { %3492 = vmatmul.mubr.msk.f32.gmra.mxu1 %vm269_vm1, %v3982_v0  ;;  %3520 = vmatprep.mubr.msk.f32.mxu0 %vm269_vm1, %v3115_v10 }
  0x9d   : > { %3494 = vmatprep.mubr.msk.f32.mxu1 %vm269_vm1, %v3081_v9 }
  0x9f   : > { %3521 = vmatmul.mubr.msk.f32.gmra.mxu0 %vm269_vm1, %v3116_v12 }
  0xa0   : > { %3495 = vmatmul.mubr.msk.f32.gmra.mxu1 %vm269_vm1, %v3082_v11  ;;  %3523 = vmatprep.mubr.msk.f32.mxu0 %vm269_vm1, %v3117_v14 }
  0xa1   : > { %3497 = vmatprep.mubr.msk.f32.mxu1 %vm269_vm1, %v3083_v13 }
  0xa3   : > { %3524 = vmatmul.mubr.msk.f32.gmra.mxu0 %vm269_vm1, %v3118_v16 }
  0xa4   : > { %3498 = vmatmul.mubr.msk.f32.gmra.mxu1 %vm269_vm1, %v3084_v15 }
  0xd7   : > { %v3296_v17 = vpop.f32.mrf.mxu0 }
  0xd8   : > { %v3308_v18 = vpop.f32.mrf.mxu1 }
  0xd9   : > { %v388_v19 = vpop.f32.mrf.mxu0 }
  0xda   : > { %v428_v20 = vpop.f32.mrf.mxu1 }
  0xdb   : > { %v3299_v21 = vpop.f32.mrf.mxu0 }
  0xdc   : > { %v3311_v22 = vpop.f32.mrf.mxu1 }
  0xdd   : > { %v398_v23 = vpop.f32.mrf.mxu0 }
  0xde   : > { %v438_v24 = vpop.f32.mrf.mxu1 }
  0xdf   : > { %v3302_v25 = vpop.f32.mrf.mxu0 }
  0xe0   : > { %v3314_v26 = vpop.f32.mrf.mxu1 }
  0xe1   : > { %v408_v27 = vpop.f32.mrf.mxu0 }
  0xe2   : > { %v448_v28 = vpop.f32.mrf.mxu1 }
  0xe3   : > { %v3305_v29 = vpop.f32.mrf.mxu0 }
  0xe4   : > { %v3317_v30 = vpop.f32.mrf.mxu1 }
  0xe5   : > { %v418_v31 = vpop.f32.mrf.mxu0 }
  0xe6   : > { %v4109_v32 = vpop.f32.mrf.mxu1 }
  0xe7   : > { %v3348_v34 = vpop.f32.mrf.mxu0 }
  0xe8   : > { %v3322_v33 = vpop.f32.mrf.mxu1 }
  0xe9   : > { %v714_v35 = vadd.f32 %v3322_v33, %v3296_v17  ;;  %v880_v37 = vpop.f32.mrf.mxu0 }
  0xea   : > { %v618_v36 = vpop.f32.mrf.mxu1 }
  0xeb   : > { %v4111_v38 = vadd.f32 %v3348_v34, %v714_v35  ;;  %v713_v39 = vadd.f32 %v618_v36, %v388_v19  ;;  %v3351_v41 = vpop.f32.mrf.mxu0 }
  0xec   : > { %v3325_v40 = vpop.f32.mrf.mxu1 }
  0xed   : > { %v4113_v42 = vadd.f32 %v880_v37, %v713_v39  ;;  %v716_v43 = vadd.f32 %v3325_v40, %v3299_v21  ;;  %v890_v45 = vpop.f32.mrf.mxu0 }
  0xee   : > { %v628_v44 = vpop.f32.mrf.mxu1 }
  0xef   : > { %v4115_v46 = vadd.f32 %v3351_v41, %v716_v43  ;;  %v715_v47 = vadd.f32 %v628_v44, %v398_v23  ;;  %v3354_v49 = vpop.f32.mrf.mxu0 }
  0xf0   : > { %v3328_v48 = vpop.f32.mrf.mxu1 }
  0xf1   : > { %v4117_v50 = vadd.f32 %v890_v45, %v715_v47  ;;  %v718_v51 = vadd.f32 %v3328_v48, %v3302_v25  ;;  %v900_v53 = vpop.f32.mrf.mxu0 }
  0xf2   : > { %v638_v52 = vpop.f32.mrf.mxu1 }
  0xf3   : > { %v4119_v54 = vadd.f32 %v3354_v49, %v718_v51  ;;  %v717_v55 = vadd.f32 %v638_v52, %v408_v27  ;;  %v3357_v57 = vpop.f32.mrf.mxu0 }
  0xf4   : > { %v3331_v56 = vpop.f32.mrf.mxu1 }
  0xf5   : > { %v4121_v58 = vadd.f32 %v900_v53, %v717_v55  ;;  %v720_v59 = vadd.f32 %v3331_v56, %v3305_v29  ;;  %v910_v61 = vpop.f32.mrf.mxu0 }
  0xf6   : > { %v648_v60 = vpop.f32.mrf.mxu1 }
  0xf7   : > { %v4123_v62 = vadd.f32 %v3357_v57, %v720_v59  ;;  %v719_v63 = vadd.f32 %v648_v60, %v418_v31  ;;  %v3360_v1 = vpop.f32.mrf.mxu0 }
  0xf8   : > { %v3334_v0 = vpop.f32.mrf.mxu1 }
  0xf9   : > { %v4125_v2 = vadd.f32 %v910_v61, %v719_v63  ;;  %v722_v3 = vadd.f32 %v3334_v0, %v3308_v18  ;;  %v920_v5 = vpop.f32.mrf.mxu0 }
  0xfa   : > { %v658_v4 = vpop.f32.mrf.mxu1 }
  0xfb   : > { %v4127_v6 = vadd.f32 %v3360_v1, %v722_v3  ;;  %v721_v7 = vadd.f32 %v658_v4, %v428_v20  ;;  %v3363_v9 = vpop.f32.mrf.mxu0 }
  0xfc   : > { %v3337_v8 = vpop.f32.mrf.mxu1 }
  0xfd   : > { %v4129_v10 = vadd.f32 %v920_v5, %v721_v7  ;;  %v724_v11 = vadd.f32 %v3337_v8, %v3311_v22  ;;  %v930_v13 = vpop.f32.mrf.mxu0 }
  0xfe   : > { %v668_v12 = vpop.f32.mrf.mxu1 }
  0xff   : > { %v4131_v14 = vadd.f32 %v3363_v9, %v724_v11  ;;  %v723_v15 = vadd.f32 %v668_v12, %v438_v24  ;;  %v3366_v17 = vpop.f32.mrf.mxu0 }
 0x100   : > { %v3340_v16 = vpop.f32.mrf.mxu1 }
 0x101   : > { %v4133_v19 = vadd.f32 %v930_v13, %v723_v15  ;;  %v726_v18 = vadd.f32 %v3340_v16, %v3314_v26  ;;  %v940_v23 = vpop.f32.mrf.mxu0 }
 0x102   : > { %v678_v21 = vpop.f32.mrf.mxu1 }
 0x103   : > { %v4135_v25 = vadd.f32 %v3366_v17, %v726_v18  ;;  %v725_v20 = vadd.f32 %v678_v21, %v448_v28  ;;  %v3369_v29 = vpop.f32.mrf.mxu0 }
 0x104   : > { %v3343_v27 = vpop.f32.mrf.mxu1 }
 0x105   : > { %v4137_v31 = vadd.f32 %v940_v23, %v725_v20  ;;  %v728_v22 = vadd.f32 %v3343_v27, %v3317_v30  ;;  %v950_v34 = vpop.f32.mrf.mxu0 }
 0x106   : > { %v688_v33 = vpop.f32.mrf.mxu1 }
 0x107   : > { %4421 = vst [vmem:[#allocation3_spill] sm:$0xff] %v4137_v31  ;;  %v4139_v35 = vadd.f32 %v3369_v29, %v728_v22  ;;  %v727_v24 = vadd.f32 %v688_v33, %v4109_v32  ;;  %v3400_v37 = vpop.f32.mrf.mxu0 }
 0x108   : > { %v3374_v36 = vpop.f32.mrf.mxu1 }
 0x109   : > { %4422 = vst [vmem:[#allocation4_spill] sm:$0xff] %v4139_v35  ;;  %v4142_v39 = vadd.f32 %v950_v34, %v727_v24  ;;  %v4144_v40 = vpop.f32.mrf.mxu0  ;;  %v1241_v35 = vadd.f32 %v3374_v36, %v4111_v38 }
 0x10a   : > { %v1145_v26 = vpop.f32.mrf.mxu1 }
 0x10b   : > { %4423 = vst [vmem:[#allocation5_spill] sm:$0xff] %v4142_v39  ;;  %v4146_v28 = vpop.f32.mrf.mxu0 }
 0x10c   : > { %v3377_v41 = vpop.f32.mrf.mxu1 }
 0x10d   : > { %v4150_v44 = vpop.f32.mrf.mxu0 }
 0x10e   : > { %v4148_v43 = vpop.f32.mrf.mxu1 }
 0x10f   : > { %v4154_v45 = vpop.f32.mrf.mxu0 }
 0x110   : > { %v4152_v30 = vpop.f32.mrf.mxu1 }
 0x111   : > { %v4158_v32 = vpop.f32.mrf.mxu0 }
 0x112   : > { %v4156_v47 = vpop.f32.mrf.mxu1 }
 0x113   : > { %v4162_v49 = vpop.f32.mrf.mxu0 }
 0x114   : > { %v4160_v48 = vpop.f32.mrf.mxu1 }
 0x115   : > { %v4166_v52 = vpop.f32.mrf.mxu0 }
 0x116   : > { %v4164_v51 = vpop.f32.mrf.mxu1 }
 0x117   : > { %v4170_v55 = vpop.f32.mrf.mxu0 }
 0x118   : > { %v4168_v53 = vpop.f32.mrf.mxu1 }
 0x119   : > { %v4174_v57 = vpop.f32.mrf.mxu0 }
 0x11a   : > { %v4172_v56 = vpop.f32.mrf.mxu1 }
 0x11b   : > { %v4178_v60 = vpop.f32.mrf.mxu0 }
 0x11c   : > { %v4176_v59 = vpop.f32.mrf.mxu1 }
 0x11d   : > { %v4182_v63 = vpop.f32.mrf.mxu0 }
 0x11e   : > { %v4180_v61 = vpop.f32.mrf.mxu1  ;;  %4424 = vst [vmem:[#allocation6_spill] sm:$0xff] %v4182_v63 }
 0x11f   : > { %v4186_v1 = vpop.f32.mrf.mxu0 }
 0x120   : > { %v4184_v0 = vpop.f32.mrf.mxu1  ;;  %4425 = vst [vmem:[#allocation7_spill] sm:$0xff] %v4186_v1 }
 0x121   : > { %v4190_v4 = vpop.f32.mrf.mxu0 }
 0x122   : > { %v4188_v3 = vpop.f32.mrf.mxu1  ;;  %4427 = vst [vmem:[#allocation9_spill] sm:$0xff] %v4190_v4 }
 0x123   : > { %4426 = vst [vmem:[#allocation8_spill] sm:$0xff] %v4188_v3  ;;  %v4194_v7 = vpop.f32.mrf.mxu0 }
 0x124   : > { %v4192_v5 = vpop.f32.mrf.mxu1  ;;  %4429 = vst [vmem:[#allocation11_spill] sm:$0xff] %v4194_v7 }
 0x125   : > { %4428 = vst [vmem:[#allocation10_spill] sm:$0xff] %v4192_v5  ;;  %v4198_v9 = vpop.f32.mrf.mxu0 }
 0x126   : > { %v4196_v8 = vpop.f32.mrf.mxu1  ;;  %4431 = vst [vmem:[#allocation13_spill] sm:$0xff] %v4198_v9 }
 0x127   : > { %4430 = vst [vmem:[#allocation12_spill] sm:$0xff] %v4196_v8  ;;  %v3452_v12 = vpop.f32.mrf.mxu0 }
 0x128   : > { %v3426_v11 = vpop.f32.mrf.mxu1 }
 0x129   : > { %v1934_v15 = vpop.f32.mrf.mxu0 }
 0x12a   : > { %v1669_v13 = vpop.f32.mrf.mxu1 }
 0x12b   : > { %v3455_v17 = vpop.f32.mrf.mxu0 }
 0x12c   : > { %v3429_v16 = vpop.f32.mrf.mxu1 }
 0x12d   : > { %v4200_v21 = vpop.f32.mrf.mxu0 }
 0x12e   : > { %v1679_v18 = vpop.f32.mrf.mxu1 }
 0x12f   : > { %v4202_v20 = vpop.f32.mrf.mxu0 }
 0x130   : > { %v3432_v23 = vpop.f32.mrf.mxu1 }
 0x131   : > { %v4206_v29 = vpop.f32.mrf.mxu0 }
 0x132   : > { %v4204_v27 = vpop.f32.mrf.mxu1 }
 0x133   : > { %v4210_v33 = vpop.f32.mrf.mxu0 }
 0x134   : > { %v4208_v22 = vpop.f32.mrf.mxu1 }
 0x135   : > { %v4214_v24 = vpop.f32.mrf.mxu0 }
 0x136   : > { %v4212_v34 = vpop.f32.mrf.mxu1 }
 0x137   : > { %v4218_v7 = vpop.f32.mrf.mxu0 }
 0x138   : > { %v4216_v9 = vpop.f32.mrf.mxu1  ;;  %4432 = vst [vmem:[#allocation14_spill] sm:$0xff] %v4218_v7  ;;  %v1240_v7 = vadd.f32 %v1145_v26, %v4113_v42  ;;  %v1245_v42 = vadd.f32 %v4152_v30, %v4119_v54  ;;  %v1247_v30 = vadd.f32 %v4160_v48, %v4123_v62 }
 0x139   : > { %v4223_v39 = vpop.f32.mrf.mxu0 }
 0x13a   : > { %v4221_v8 = vpop.f32.mrf.mxu1  ;;  %4433 = vst [vmem:[#allocation15_spill] sm:$0xff] %v4223_v39  ;;  %v1503_v39 = vadd.f32 %v3400_v37, %v1241_v35  ;;  %v1502_v36 = vadd.f32 %v4144_v40, %v1240_v7  ;;  %v1507_v54 = vadd.f32 %v4154_v45, %v1245_v42 }
 0x13b   : > { %v4227_v5 = vpop.f32.mrf.mxu0 }
 0x13c   : > { %v4225_v4 = vpop.f32.mrf.mxu1  ;;  %4435 = vst [vmem:[#allocation17_spill] sm:$0xff] %v4227_v5  ;;  %v1764_v37 = vadd.f32 %v1669_v13, %v1502_v36  ;;  %v1246_v36 = vadd.f32 %v4164_v51, %v4125_v2  ;;  %v1249_v2 = vadd.f32 %v4168_v53, %v4127_v6 }
 0x13d   : > { %4434 = vst [vmem:[#allocation16_spill] sm:$0xff] %v4225_v4  ;;  %v4235_v3 = vpop.f32.mrf.mxu0  ;;  %v1243_v4 = vadd.f32 %v3377_v41, %v4115_v46 }
 0x13e   : > { %v4233_v1 = vpop.f32.mrf.mxu1  ;;  %4437 = vst [vmem:[#allocation19_spill] sm:$0xff] %v4235_v3  ;;  %v1242_v3 = vadd.f32 %v4148_v43, %v4117_v50  ;;  %v1244_v50 = vadd.f32 %v4156_v47, %v4121_v58 }
 0x13f   : > { %4436 = vst [vmem:[#allocation18_spill] sm:$0xff] %v4233_v1  ;;  %v4240_v63 = vpop.f32.mrf.mxu0  ;;  %v1765_v1 = vadd.f32 %v3426_v11, %v1503_v39  ;;  %v1505_v46 = vadd.f32 %v4146_v28, %v1243_v4  ;;  %v2029_v4 = vadd.f32 %v1934_v15, %v1764_v37 }
 0x140   : > { %v4238_v31 = vpop.f32.mrf.mxu1  ;;  %v1504_v40 = vadd.f32 %v4150_v44, %v1242_v3  ;;  %v1769_v44 = vadd.f32 %v3432_v23, %v1507_v54  ;;  %v1506_v47 = vadd.f32 %v4158_v32, %v1244_v50  ;;  %v1509_v3 = vadd.f32 %v4162_v49, %v1247_v30 }
 0x141   : > { %v4247_v38 = vpop.f32.mrf.mxu0  ;;  %v2030_v39 = vadd.f32 %v3452_v12, %v1765_v1  ;;  %v1767_v43 = vadd.f32 %v3429_v16, %v1505_v46  ;;  %v1248_v49 = vadd.f32 %v4172_v56, %v4129_v10  ;;  %v1251_v10 = vadd.f32 %v4176_v59, %v4131_v14 }
 0x142   : > { %v4245_v5 = vpop.f32.mrf.mxu1  ;;  %4438 = vst [vmem:[#allocation20_spill] sm:$0xff] %v4247_v38  ;;  %v1766_v11 = vadd.f32 %v1679_v18, %v1504_v40  ;;  %v1768_v16 = vadd.f32 %v4204_v27, %v1506_v47  ;;  %v2034_v23 = vadd.f32 %v4202_v20, %v1769_v44  ;;  %v1771_v42 = vadd.f32 %v4208_v22, %v1509_v3  ;;  %v4441_v44 = vld [vmem:[#allocation8_spill] sm:$0xff] }
 0x143   : > { %v4256_v35 = vpop.f32.mrf.mxu0  ;;  %v2032_v62 = vadd.f32 %v3455_v17, %v1767_v43  ;;  %v1508_v17 = vadd.f32 %v4166_v52, %v1246_v36  ;;  %v1511_v52 = vadd.f32 %v4170_v55, %v1249_v2  ;;  %v1250_v55 = vadd.f32 %v4180_v61, %v4133_v19  ;;  %v4444_v2 = vld [vmem:[#allocation7_spill] sm:$0xff] }
 0x144   : > { %v4254_v26 = vpop.f32.mrf.mxu1  ;;  %v2031_v15 = vadd.f32 %v4200_v21, %v1766_v11  ;;  %v2033_v37 = vadd.f32 %v4206_v29, %v1768_v16  ;;  %v2036_v54 = vadd.f32 %v4210_v33, %v1771_v42  ;;  %v4443_v47 = vld [vmem:[#allocation16_spill] sm:$0xff] }
 0x145   : > { %v4261_v38 = vpop.f32.mrf.mxu0  ;;  %v1770_v22 = vadd.f32 %v4212_v34, %v1508_v17  ;;  %v1773_v43 = vadd.f32 %v4216_v9, %v1511_v52  ;;  %v4449_v52 = vld [vmem:[#allocation9_spill] sm:$0xff] }
 0x146   : > { %v4259_v41 = vpop.f32.mrf.mxu1 }
 0x147   : > { %v3504_v28 = vpop.f32.mrf.mxu0 }
 0x148   : > { %v3478_v7 = vpop.f32.mrf.mxu1 }
 0x149   : > { %v2292_v13 = vadd.f32 %v3478_v7, %v2030_v39  ;;  %v2458_v45 = vpop.f32.mrf.mxu0  ;;  %v1510_v39 = vadd.f32 %v4174_v57, %v1248_v49  ;;  %v1513_v7 = vadd.f32 %v4178_v60, %v1251_v10  ;;  %v1253_v57 = vadd.f32 %v4184_v0, %v4135_v25  ;;  %v4440_v60 = vld [vmem:[#allocation3_spill] sm:$0xff]  ;;  %v4442_v25 = vld [vmem:[#allocation14_spill] sm:$0xff] }
 0x14a   : > { %v2196_v58 = vpop.f32.mrf.mxu1  ;;  %v2038_v0 = vadd.f32 %v4442_v25, %v1773_v43 }
 0x14b   : > { %v4277_v48 = vadd.f32 %v3504_v28, %v2292_v13  ;;  %v2291_v1 = vadd.f32 %v2196_v58, %v2029_v4  ;;  %v3507_v12 = vpop.f32.mrf.mxu0  ;;  %v1772_v19 = vadd.f32 %v4221_v8, %v1510_v39  ;;  %v2035_v28 = vadd.f32 %v4214_v24, %v1770_v22  ;;  %v4439_v13 = vld [vmem:[#allocation6_spill] sm:$0xff] }
 0x14c   : > { %v3481_v51 = vpop.f32.mrf.mxu1  ;;  %v1512_v36 = vadd.f32 %v4439_v13, %v1250_v55  ;;  %v1252_v58 = vadd.f32 %v4441_v44, %v4440_v60  ;;  %v4452_v55 = vld [vmem:[#allocation17_spill] sm:$0xff] }
 0x14d   : > { %2602 = vst [vmem:[%s4274_s29 + $0x8] sm:$0xff] %v4277_v48  ;;  %v4286_v18 = vadd.f32 %v2458_v45, %v2291_v1  ;;  %v2294_v32 = vadd.f32 %v3481_v51, %v2032_v62  ;;  %v2468_v53 = vpop.f32.mrf.mxu0  ;;  %v1775_v62 = vadd.f32 %v4443_v47, %v1513_v7  ;;  %v1515_v51 = vadd.f32 %v4444_v2, %v1253_v57 }
 0x14e   : > { %v2206_v6 = vpop.f32.mrf.mxu1  ;;  %v1514_v10 = vadd.f32 %v4449_v52, %v1252_v58 }
 0x14f   : > { %2601 = vst [vmem:[%s4274_s29] sm:$0xff] %v4286_v18  ;;  %v2617_v21 = vadd.f32 %v4277_v48, %v4286_v18  ;;  %v4297_v27 = vadd.f32 %v3507_v12, %v2294_v32  ;;  %v2293_v46 = vadd.f32 %v2206_v6, %v2031_v15  ;;  %v3510_v20 = vpop.f32.mrf.mxu0  ;;  %v4445_v12 = vld [vmem:[#allocation4_spill] sm:$0xff]  ;;  %v4446_v15 = vld [vmem:[#allocation10_spill] sm:$0xff]  ;;  %v4447_v32 = vld [vmem:[#allocation15_spill] sm:$0xff]  ;;  %v1777_v22 = vadd.f32 %v4238_v31, %v1515_v51 }
 0x150   : > { %v3484_v56 = vpop.f32.mrf.mxu1  ;;  %v1255_v16 = vadd.f32 %v4446_v15, %v4445_v12  ;;  %v2037_v17 = vadd.f32 %v4447_v32, %v1772_v19  ;;  %v4448_v6 = vld [vmem:[#allocation18_spill] sm:$0xff]  ;;  %v2040_v43 = vadd.f32 %v4452_v55, %v1775_v62  ;;  %v1776_v7 = vadd.f32 %v4245_v5, %v1514_v10 }
 0x151   : > { %2604 = vst [vmem:[%s4274_s29 + $0x18] sm:$0xff] %v4297_v27  ;;  %v4306_v40 = vadd.f32 %v2468_v53, %v2293_v46  ;;  %v2296_v50 = vadd.f32 %v3484_v56, %v2034_v23  ;;  %v2478_v59 = vpop.f32.mrf.mxu0  ;;  %v1774_v53 = vadd.f32 %v4448_v6, %v1512_v36  ;;  %v4450_v56 = vld [vmem:[#allocation5_spill] sm:$0xff]  ;;  %v2042_v36 = vadd.f32 %v4240_v63, %v1777_v22 }
 0x152   : > { %v2216_v14 = vpop.f32.mrf.mxu1 }
 0x153   : > { %2603 = vst [vmem:[%s4274_s29 + $0x10] sm:$0xff] %v4306_v40  ;;  %v2618_v29 = vadd.f32 %v2617_v21, %v4306_v40  ;;  %v4316_v34 = vadd.f32 %v3510_v20, %v2296_v50  ;;  %v2295_v30 = vadd.f32 %v2216_v14, %v2033_v37  ;;  %v3513_v9 = vpop.f32.mrf.mxu0  ;;  %v4451_v20 = vld [vmem:[#allocation12_spill] sm:$0xff] }
 0x154   : > { %v3487_v61 = vpop.f32.mrf.mxu1  ;;  %v1254_v37 = vadd.f32 %v4451_v20, %v4450_v56 }
 0x155   : > { %2606 = vst [vmem:[%s4274_s29 + $0x28] sm:$0xff] %v4316_v34  ;;  %v4325_v33 = vadd.f32 %v2478_v59, %v2295_v30  ;;  %v2619_v4 = vadd.f32 %v2618_v29, %v4297_v27  ;;  %v2298_v11 = vadd.f32 %v3487_v61, %v2036_v54  ;;  %v2488_v45 = vpop.f32.mrf.mxu0  ;;  %v4453_v29 = vld [vmem:[#allocation11_spill] sm:$0xff] }
 0x156   : > { %v2226_v8 = vpop.f32.mrf.mxu1  ;;  %v1517_v30 = vadd.f32 %v4453_v29, %v1255_v16  ;;  %v4454_v61 = vld [vmem:[#allocation19_spill] sm:$0xff] }
 0x157   : > { %2605 = vst [vmem:[%s4274_s29 + $0x20] sm:$0xff] %v4325_v33  ;;  %v2620_v24 = vadd.f32 %v2619_v4, %v4325_v33  ;;  %v4336_v1 = vadd.f32 %v3513_v9, %v2298_v11  ;;  %v2297_v3 = vadd.f32 %v2226_v8, %v2035_v28  ;;  %v3516_v23 = vpop.f32.mrf.mxu0  ;;  %v2039_v31 = vadd.f32 %v4454_v61, %v1774_v53  ;;  %v4455_v11 = vld [vmem:[#allocation13_spill] sm:$0xff]  ;;  %v4456_v8 = vld [vmem:[#allocation20_spill] sm:$0xff] }
 0x158   : > { %v3490_v49 = vpop.f32.mrf.mxu1  ;;  %v1516_v13 = vadd.f32 %v4455_v11, %v1254_v37  ;;  %v1779_v5 = vadd.f32 %v4254_v26, %v1517_v30 }
 0x159   : > { %2608 = vst [vmem:[%s4274_s29 + $0x38] sm:$0xff] %v4336_v1  ;;  %v4345_v42 = vadd.f32 %v2488_v45, %v2297_v3  ;;  %v2621_v21 = vadd.f32 %v2620_v24, %v4316_v34  ;;  %v2300_v46 = vadd.f32 %v3490_v49, %v2038_v0  ;;  %v2498_v39 = vpop.f32.mrf.mxu0  ;;  %v2041_v45 = vadd.f32 %v4456_v8, %v1776_v7 }
 0x15a   : > { %v2236_v50 = vpop.f32.mrf.mxu1  ;;  %v1778_v24 = vadd.f32 %v4259_v41, %v1516_v13  ;;  %v2044_v12 = vadd.f32 %v4256_v35, %v1779_v5 }
 0x15b   : > { %2607 = vst [vmem:[%s4274_s29 + $0x30] sm:$0xff] %v4345_v42  ;;  %v2622_v14 = vadd.f32 %v2621_v21, %v4345_v42  ;;  %v4356_v59 = vadd.f32 %v3516_v23, %v2300_v46  ;;  %v2299_v54 = vadd.f32 %v2236_v50, %v2037_v17  ;;  %v3519_v19 = vpop.f32.mrf.mxu0 }
 0x15c   : > { %v3493_v57 = vpop.f32.mrf.mxu1  ;;  %v2043_v41 = vadd.f32 %v4261_v38, %v1778_v24 }
 0x15d   : > { %2610 = vst [vmem:[%s4274_s29 + $0x48] sm:$0xff] %v4356_v59  ;;  %v4363_v9 = vadd.f32 %v2498_v39, %v2299_v54  ;;  %v2623_v28 = vadd.f32 %v2622_v14, %v4336_v1  ;;  %v2302_v4 = vadd.f32 %v3493_v57, %v2040_v43  ;;  %v2508_v44 = vpop.f32.mrf.mxu0 }
 0x15e   : > { %v2246_v60 = vpop.f32.mrf.mxu1 }
 0x15f   : > { %2609 = vst [vmem:[%s4274_s29 + $0x40] sm:$0xff] %v4363_v9  ;;  %v2624_v58 = vadd.f32 %v2623_v28, %v4363_v9  ;;  %v2564_v25 = vadd.f32 %v3519_v19, %v2302_v4  ;;  %v2301_v0 = vadd.f32 %v2246_v60, %v2039_v31  ;;  %v3522_v62 = vpop.f32.mrf.mxu0 }
 0x160   : > { %v3496_v47 = vpop.f32.mrf.mxu1 }
 0x161   : > { %2612 = vst [vmem:[%s4274_s29 + $0x58] sm:$0xff] %v2564_v25  ;;  %v2563_v63 = vadd.f32 %v2508_v44, %v2301_v0  ;;  %v2625_v3 = vadd.f32 %v2624_v58, %v4356_v59  ;;  %v2304_v2 = vadd.f32 %v3496_v47, %v2042_v36  ;;  %v2518_v51 = vpop.f32.mrf.mxu0 }
 0x162   : > { %v2256_v26 = vpop.f32.mrf.mxu1 }
 0x163   : > { %2611 = vst [vmem:[%s4274_s29 + $0x50] sm:$0xff] %v2563_v63  ;;  %v2626_v15 = vadd.f32 %v2625_v3, %v2563_v63  ;;  %v2566_v16 = vadd.f32 %v3522_v62, %v2304_v2  ;;  %v2303_v32 = vadd.f32 %v2256_v26, %v2041_v45  ;;  %v3525_v49 = vpop.f32.mrf.mxu0 }
 0x164   : > { %v3499_v17 = vpop.f32.mrf.mxu1 }
 0x165   : > { %2614 = vst [vmem:[%s4274_s29 + $0x68] sm:$0xff] %v2566_v16  ;;  %v2565_v23 = vadd.f32 %v2518_v51, %v2303_v32  ;;  %v2627_v6 = vadd.f32 %v2626_v15, %v2564_v25  ;;  %v2306_v53 = vadd.f32 %v3499_v17, %v2044_v12  ;;  %v2528_v10 = vpop.f32.mrf.mxu0 }
 0x166   : > { %v2266_v21 = vpop.f32.mrf.mxu1 }
 0x167   : > { %2613 = vst [vmem:[%s4274_s29 + $0x60] sm:$0xff] %v2565_v23  ;;  %v2628_v46 = vadd.f32 %v2627_v6, %v2565_v23  ;;  %v2568_v35 = vadd.f32 %v3525_v49, %v2306_v53  ;;  %v2305_v52 = vadd.f32 %v2266_v21, %v2043_v41 }
 0x169   : > { %2616 = vst [vmem:[%s4274_s29 + $0x78] sm:$0xff] %v2568_v35  ;;  %v2567_v56 = vadd.f32 %v2528_v10, %v2305_v52  ;;  %v2629_v20 = vadd.f32 %v2628_v46, %v2566_v16 }
 0x16b   : > { %2615 = vst [vmem:[%s4274_s29 + $0x70] sm:$0xff] %v2567_v56  ;;  %v2630_v37 = vadd.f32 %v2629_v20, %v2567_v56 }
 0x16d   : > { %v2631_v22 = vadd.f32 %v2630_v37, %v2568_v35 }
 0x16f   : > { %v2632_v38 = vrot.slane %v2631_v22, 4 }
 0x171   : > { %v2633_v50 = vadd.f32 %v2632_v38, %v2631_v22 }
 0x173   : > { %v2634_v39 = vrot.slane %v2633_v50, 2 }
 0x175   : > { %v2635_v55 = vadd.f32 %v2634_v39, %v2633_v50 }
 0x177   : > { %v2636_v43 = vrot.slane %v2635_v55, 1 }
 0x179   : > { %v2637_v14 = vadd.f32 %v2636_v43, %v2635_v55 }
 0x17b   : > { %v2638_v54 = vmul.f32 0.0078125, %v2637_v14  ;;  %2655 = vst [vmem:[%s4388_s8] sm:$0x1] %v2637_v14 }
 0x17d   : > { %v2639_v29 = vsub.f32 %v4286_v18, %v2638_v54  ;;  %v2640_v30 = vsub.f32 %v4277_v48, %v2638_v54  ;;  %v2641_v7 = vsub.f32 %v4306_v40, %v2638_v54  ;;  %v2642_v57 = vsub.f32 %v4297_v27, %v2638_v54 }
 0x17e   : > { %v2643_v19 = vsub.f32 %v4325_v33, %v2638_v54  ;;  %v2644_v61 = vsub.f32 %v4316_v34, %v2638_v54  ;;  %v2645_v31 = vsub.f32 %v4345_v42, %v2638_v54  ;;  %v2646_v28 = vsub.f32 %v4336_v1, %v2638_v54 }
 0x17f   : > { %v2647_v4 = vsub.f32 %v4363_v9, %v2638_v54  ;;  %v2648_v11 = vsub.f32 %v4356_v59, %v2638_v54  ;;  %v2649_v13 = vsub.f32 %v2563_v63, %v2638_v54  ;;  %v2650_v18 = vsub.f32 %v2564_v25, %v2638_v54 }
 0x180   : > { %v2651_v36 = vsub.f32 %v2565_v23, %v2638_v54  ;;  %v2652_v48 = vsub.f32 %v2566_v16, %v2638_v54  ;;  %v2653_v60 = vsub.f32 %v2567_v56, %v2638_v54  ;;  %v2654_v40 = vsub.f32 %v2568_v35, %v2638_v54 }
 0x181   : > { %v2656_v44 = vmul.f32 %v2639_v29, %v2639_v29  ;;  %v2657_v27 = vmul.f32 %v2640_v30, %v2640_v30  ;;  %v2658_v5 = vmul.f32 %v2641_v7, %v2641_v7  ;;  %v2659_v58 = vmul.f32 %v2642_v57, %v2642_v57 }
 0x182   : > { %v2660_v0 = vmul.f32 %v2643_v19, %v2643_v19  ;;  %v2661_v8 = vmul.f32 %v2644_v61, %v2644_v61  ;;  %v2662_v45 = vmul.f32 %v2645_v31, %v2645_v31  ;;  %v2663_v47 = vmul.f32 %v2646_v28, %v2646_v28 }
 0x183   : > { %v2672_v33 = vadd.f32 %v2657_v27, %v2656_v44  ;;  %v2664_v62 = vmul.f32 %v2647_v4, %v2647_v4  ;;  %v2665_v24 = vmul.f32 %v2648_v11, %v2648_v11  ;;  %v2666_v3 = vmul.f32 %v2649_v13, %v2649_v13 }
 0x184   : > { %v2667_v26 = vmul.f32 %v2650_v18, %v2650_v18  ;;  %v2668_v12 = vmul.f32 %v2651_v36, %v2651_v36  ;;  %v2669_v16 = vmul.f32 %v2652_v48, %v2652_v48  ;;  %v2670_v17 = vmul.f32 %v2653_v60, %v2653_v60 }
 0x185   : > { %v2673_v34 = vadd.f32 %v2672_v33, %v2658_v5  ;;  %v2671_v41 = vmul.f32 %v2654_v40, %v2654_v40 }
 0x187   : > { %v2674_v42 = vadd.f32 %v2673_v34, %v2659_v58 }
 0x189   : > { %v2675_v1 = vadd.f32 %v2674_v42, %v2660_v0 }
 0x18b   : > { %v2676_v9 = vadd.f32 %v2675_v1, %v2661_v8 }
 0x18d   : > { %v2677_v59 = vadd.f32 %v2676_v9, %v2662_v45 }
 0x18f   : > { %v2678_v25 = vadd.f32 %v2677_v59, %v2663_v47 }
 0x191   : > { %v2679_v63 = vadd.f32 %v2678_v25, %v2664_v62 }
 0x193   : > { %v2680_v2 = vadd.f32 %v2679_v63, %v2665_v24 }
 0x195   : > { %v2681_v51 = vadd.f32 %v2680_v2, %v2666_v3 }
 0x197   : > { %v2682_v15 = vadd.f32 %v2681_v51, %v2667_v26 }
 0x199   : > { %v2683_v32 = vadd.f32 %v2682_v15, %v2668_v12 }
 0x19b   : > { %v2684_v49 = vadd.f32 %v2683_v32, %v2669_v16 }
 0x19d   : > { %v2685_v23 = vadd.f32 %v2684_v49, %v2670_v17 }
 0x19f   : > { %v2686_v6 = vadd.f32 %v2685_v23, %v2671_v41 }
 0x1a1   : > { %v2687_v53 = vrot.slane %v2686_v6, 4 }
 0x1a3   : > { %v2688_v21 = vadd.f32 %v2687_v53, %v2686_v6 }
 0x1a5   : > { %v2689_v46 = vrot.slane %v2688_v21, 2 }
 0x1a7   : > { %v2690_v35 = vadd.f32 %v2689_v46, %v2688_v21 }
 0x1a9   : > { %v2691_v52 = vrot.slane %v2690_v35, 1 }
 0x1ab   : > { %v2692_v10 = vadd.f32 %v2691_v52, %v2690_v35 }
 0x1ad   : > { %2693 = vst [vmem:[%s4388_s8 + $0x1] sm:$0x1] %v2692_v10 }
 0x1ae PF: > { %s14_s16 = sadd.s32 1, %s3607_s16   ;;  %s4457_s12 = smov %s3599_s14 }
 0x1af   : > { %p11_p7 = scmp.ge.s32.totalorder %s14_s16, 6   ;;  %s4458_s13 = smov %s3603_s15 }
 0x1b0   : > { %s4459_s14 = smov %s4462_s17  ;;  %s4460_s15 = smov %s4466_s18 }
 0x1b1   :  { %13 = sbr.rel (!%p11_p7) target bundleno = 3 (0x3), region = 84 }

</bundles_post_ra>
